<compile_context>
chip_gen: v6e
topology: v6e:2x2x1
jax: 0.10.0
libtpu: 0.0.40
codegen_flags: <defaults>
</compile_context>

<pallas_src>
import jax
import jax.numpy as jnp
from jax.experimental import pallas as pl
from jax.experimental.pallas import tpu as pltpu


# --------------------------- fused forward kernel --------------------------- #
def _make_fused_kernel(T, BT, H, num_layer):
    def kernel(*refs):
        x_ref = refs[0]                    # (T, BT, E)  bf16 batch-tiled embeddings
        len_ref = refs[1]                  # (BT, 1)     i32  lengths (0 on pad rows)
        lrefs = [refs[2 + 4 * l: 2 + 4 * (l + 1)] for l in range(num_layer)]
        base = 2 + 4 * num_layer
        wd_ref = refs[base]                # (H, L) f32
        bd_ref = refs[base + 1]            # (1, L) f32
        out_ref = refs[base + 2]           # (BT, L) f32
        gi0_ref = refs[base + 3]           # (T, BT, 3H) f32 scratch (layer-0 proj)

        # Hoist all weight/bias loads out of the unrolled loops (vreg-resident).
        wih = [r[0][...] for r in lrefs]   # (in, 3H) bf16, gates [r|z|n] on lanes
        whh = [r[1][...] for r in lrefs]   # (H, 3H)  bf16
        bi = [r[2][...] for r in lrefs]    # (1, 3H)  f32  (b_ih + b_hh[r,z] folded)
        bhn = [r[3][...] for r in lrefs]   # (1, H)   f32  (n-gate b_hh, stays in r*(.))

        # Layer-0 input projection, hoisted off the recurrence: gate-fused
        # (BT, E) @ (E, 3H) dots are independent of h, so the scheduler overlaps
        # them with the recurrent chain; materialized in VMEM so each step reads
        # one contiguous 96-lane slab.  (For large T, switch the unrolled loops
        # to lax.fori_loop with partial unroll.)
        for t in range(T):
            gi0_ref[t] = (jnp.dot(x_ref[t], wih[0],
                                  preferred_element_type=jnp.float32) + bi[0])

        def gru_cell(gi, gh, h, bhn_l):
            # gi / gh: (BT, 3H) fused pre-activations; h: (BT, H) f32.
            r = jax.nn.sigmoid(gi[:, :H] + gh[:, :H])
            z = jax.nn.sigmoid(gi[:, H:2 * H] + gh[:, H:2 * H])
            n = jnp.tanh(gi[:, 2 * H:] + r * (gh[:, 2 * H:] + bhn_l))
            return n + z * (h - n)         # == (1-z)*n + z*h, shorter VPU chain

        hs = [jnp.zeros((BT, H), jnp.float32) for _ in range(num_layer)]
        hbs = [jnp.zeros((BT, H), jnp.bfloat16) for _ in range(num_layer)]
        h_last = jnp.zeros((BT, H), jnp.float32)
        lens = len_ref[...]

        # Wavefront over (time, layer): layer l's step t is emitted right after
        # layer l-1's step t; since layer-(l-1) step t+1 does not depend on
        # layer-l step t, the LLO scheduler co-issues their MXU / EUP / VPU work.
        for t in range(T):
            for l in range(num_layer):
                if l == 0:
                    gi = gi0_ref[t]
                else:
                    # Per-step gate-fused input projection for upper layers (it
                    # cannot be hoisted under the wavefront; it is off the
                    # recurrent critical chain of layer l).
                    gi = jnp.dot(hbs[l - 1], wih[l],
                                 preferred_element_type=jnp.float32) + bi[l]
                gh = jnp.dot(hbs[l], whh[l], preferred_element_type=jnp.float32)
                hs[l] = gru_cell(gi, gh, hs[l], bhn[l])
                hbs[l] = hs[l].astype(jnp.bfloat16)
                # TODO(synk): nn.GRU inter-layer dropout is identity at inference; omitted.
            # Capture the top layer's h at the last valid timestep (no (T,B,H)
            # HBM writeback, no XLA gather).  length==0 rows keep the zero state.
            h_last = jnp.where(lens == (t + 1), hs[num_layer - 1], h_last)

        # Dense + log_softmax epilogue (f32 for fidelity; size is negligible).
        logits = jnp.dot(h_last, wd_ref[...],
                         preferred_element_type=jnp.float32) + bd_ref[...]
        m = jnp.max(logits, axis=-1, keepdims=True)
        s = logits - m
        out_ref[...] = s - jnp.log(jnp.sum(jnp.exp(s), axis=-1, keepdims=True))

    return kernel


# ------------------------ one-time parameter re-layout ----------------------- #
def prepare_params(params):
    """Model-load-time weight re-layout (outside the jitted forward):
    gate-fused bf16 weights, folded biases, bf16 embedding table, dense^T."""
    H = params["gru_layers"][0]["w_hh"].shape[1]
    layers = []
    for layer in params["gru_layers"]:
        w_ih, w_hh = layer["w_ih"], layer["w_hh"]     # (3H, in), (3H, H); gates [r,z,n]
        b_ih, b_hh = layer["b_ih"], layer["b_hh"]     # (3H,)
        wih_f = jnp.asarray(w_ih).T.astype(jnp.bfloat16)          # (in, 3H)
        whh_f = jnp.asarray(w_hh).T.astype(jnp.bfloat16)          # (H, 3H)
        # Fold b_ih (all gates) + b_hh (r, z) into the input projection bias;
        # the n-gate b_hh must stay inside r*(.) and is passed separately.
        bi_f = (b_ih + jnp.concatenate([b_hh[:2 * H],
                                        jnp.zeros((H,), b_hh.dtype)])
                ).reshape(1, 3 * H).astype(jnp.float32)
        bhn = b_hh[2 * H:].reshape(1, H).astype(jnp.float32)
        layers.append((wih_f, whh_f, bi_f, bhn))
    return {
        "embedding": params["embedding"].astype(jnp.bfloat16),    # bf16 gather table
        "layers": layers,
        "dense_w": params["dense_w"].T.astype(jnp.float32),       # (H, L)
        "dense_b": params["dense_b"].reshape(1, -1).astype(jnp.float32),
    }


# --------------------------------- wrapper ----------------------------------- #
def rnn_classifier_forward(prepped, tokens, lengths):
    """tokens: (T, B) int32, zero-padded past each length; lengths: (B,) int32."""
    T, B = tokens.shape
    emb = prepped["embedding"]
    E = emb.shape[1]
    H = prepped["layers"][0][1].shape[0]
    L = prepped["dense_w"].shape[1]
    num_layer = len(prepped["layers"])

    # Batch padding / tiling: keep batch in the MXU row dim up to 256; beyond
    # that tile it on a "parallel" grid axis (both TensorCores on v7x; a
    # single-tile grid on v5e/v6e is harmless).
    BT_MAX = 256
    Bp = max(8, -(-B // 8) * 8)
    if Bp > BT_MAX:
        Bp = -(-B // BT_MAX) * BT_MAX
        BT = BT_MAX
    else:
        BT = Bp
    grid = (Bp // BT,)

    # Embedding lookup stays in XLA (data-dependent gather); bf16 halves the
    # only non-trivial activation DMA into the kernel.
    embeds = emb[tokens]                                           # (T, B, E) bf16
    x = jnp.zeros((T, Bp, E), jnp.bfloat16).at[:, :B, :].set(embeds)
    # Clamp to [0, T]: PyTorch's pack_padded_sequence would reject length > T;
    # clamping avoids silently returning the zero state for such rows.
    lens = jnp.clip(lengths.astype(jnp.int32), 0, T)
    len_p = jnp.zeros((Bp, 1), jnp.int32).at[:B, 0].set(lens)

    args = [x, len_p]
    in_specs = [
        pl.BlockSpec((T, BT, E), lambda b: (0, b, 0)),
        pl.BlockSpec((BT, 1), lambda b: (b, 0)),
    ]
    for (wih_f, whh_f, bi_f, bhn) in prepped["layers"]:
        args += [wih_f, whh_f, bi_f, bhn]
        in_specs += [
            pl.BlockSpec(wih_f.shape, lambda b: (0, 0)),
            pl.BlockSpec(whh_f.shape, lambda b: (0, 0)),
            pl.BlockSpec(bi_f.shape, lambda b: (0, 0)),
            pl.BlockSpec(bhn.shape, lambda b: (0, 0)),
        ]
    args += [prepped["dense_w"], prepped["dense_b"]]
    in_specs += [
        pl.BlockSpec((H, L), lambda b: (0, 0)),
        pl.BlockSpec((1, L), lambda b: (0, 0)),
    ]

    # VMEM budget per program: x block (T*BT*E bf16) + all layer weights (bf16)
    # + (T, BT, 3H) f32 scratch -- a few hundred KiB at realistic sizes here;
    # 32 MiB is comfortably inside every generation (v7x physical VMEM = 64 MiB).
    out_p = pl.pallas_call(
        _make_fused_kernel(T, BT, H, num_layer),
        out_shape=jax.ShapeDtypeStruct((Bp, L), jnp.float32),
        grid=grid,
        in_specs=in_specs,
        out_specs=pl.BlockSpec((BT, L), lambda b: (b, 0)),
        scratch_shapes=[pltpu.VMEM((T, BT, 3 * H), jnp.float32)],
        compiler_params=pltpu.CompilerParams(
            dimension_semantics=("parallel",),
            vmem_limit_bytes=32 * 1024 * 1024,
        ),
    )(*args)
    return out_p[:B]


# ----------------------------------- main ------------------------------------ #
if __name__ == "__main__":
    vocab_size, nembedding, hidden_size, num_layer, label_size = 50, 16, 32, 2, 5
    T, B = 8, 4

    key = jax.random.PRNGKey(0)
    keys = jax.random.split(key, 4 * num_layer + 5)

    def uni(k, shape, scale):
        return jax.random.uniform(k, shape, jnp.float32, -scale, scale)

    scale = 1.0 / (hidden_size ** 0.5)
    params = {"embedding": jax.random.normal(keys[0], (vocab_size, nembedding),
                                             jnp.float32)}
    gru_layers = []
    ki = 1
    for l in range(num_layer):
        in_sz = nembedding if l == 0 else hidden_size
        gru_layers.append({
            "w_ih": uni(keys[ki + 0], (3 * hidden_size, in_sz), scale),
            "w_hh": uni(keys[ki + 1], (3 * hidden_size, hidden_size), scale),
            "b_ih": uni(keys[ki + 2], (3 * hidden_size,), scale),
            "b_hh": uni(keys[ki + 3], (3 * hidden_size,), scale),
        })
        ki += 4
    params["gru_layers"] = gru_layers
    params["dense_w"] = uni(keys[ki + 0], (label_size, hidden_size), scale)
    params["dense_b"] = uni(keys[ki + 1], (label_size,), scale)

    # One-time (load-time) re-layout; kept outside the jitted forward.
    prepped = prepare_params(params)

    # Padded token batch (lengths sorted descending, padding value 0).
    lengths = jnp.array([8, 6, 5, 3], dtype=jnp.int32)
    raw_tokens = jax.random.randint(keys[ki + 2], (T, B), 1, vocab_size,
                                    dtype=jnp.int32)
    valid = jnp.arange(T, dtype=jnp.int32)[:, None] < lengths[None, :]
    tokens = jnp.where(valid, raw_tokens, 0)

    forward = jax.jit(rnn_classifier_forward)
    out = forward(prepped, tokens, lengths)
    jax.block_until_ready(out)

    assert out.shape == (B, label_size)
    # log_softmax rows must exponentiate-sum to 1.
    row_sums = jnp.exp(out).sum(axis=-1)
    assert bool(jnp.all(jnp.abs(row_sums - 1.0) < 1e-3))
    print("KERNEL_OK")
</pallas_src>

<mosaic_0001>
module attributes {stable_mosaic.version = 11 : i64} {
  func.func @kernel(%arg0: i32, %arg1: memref<8x8x16xbf16, #tpu.memory_space<vmem>>, %arg2: memref<8x1xi32, #tpu.memory_space<vmem>>, %arg3: memref<16x96xbf16, #tpu.memory_space<vmem>>, %arg4: memref<32x96xbf16, #tpu.memory_space<vmem>>, %arg5: memref<1x96xf32, #tpu.memory_space<vmem>>, %arg6: memref<1x32xf32, #tpu.memory_space<vmem>>, %arg7: memref<32x96xbf16, #tpu.memory_space<vmem>>, %arg8: memref<32x96xbf16, #tpu.memory_space<vmem>>, %arg9: memref<1x96xf32, #tpu.memory_space<vmem>>, %arg10: memref<1x32xf32, #tpu.memory_space<vmem>>, %arg11: memref<32x5xf32, #tpu.memory_space<vmem>>, %arg12: memref<1x5xf32, #tpu.memory_space<vmem>>, %arg13: memref<8x5xf32, #tpu.memory_space<vmem>>, %arg14: memref<8x8x96xf32, #tpu.memory_space<vmem>>) attributes {dimension_semantics = [#tpu.dimension_semantics<parallel>], iteration_bounds = array<i64: 1>, scalar_prefetch = 0 : i64, scratch_operands = 1 : i64, tpu.core_type = #tpu.core_type<tc>, window_params = [{transform_indices = @transform_0, window_bounds = array<i64: 8, 8, 16>}, {transform_indices = @transform_1, window_bounds = array<i64: 8, 1>}, {pipeline_mode = #tpu.pipeline_mode<synchronous>, transform_indices = @transform_2, window_bounds = array<i64: 16, 96>}, {pipeline_mode = #tpu.pipeline_mode<synchronous>, transform_indices = @transform_3, window_bounds = array<i64: 32, 96>}, {pipeline_mode = #tpu.pipeline_mode<synchronous>, transform_indices = @transform_4, window_bounds = array<i64: 1, 96>}, {pipeline_mode = #tpu.pipeline_mode<synchronous>, transform_indices = @transform_5, window_bounds = array<i64: 1, 32>}, {pipeline_mode = #tpu.pipeline_mode<synchronous>, transform_indices = @transform_6, window_bounds = array<i64: 32, 96>}, {pipeline_mode = #tpu.pipeline_mode<synchronous>, transform_indices = @transform_7, window_bounds = array<i64: 32, 96>}, {pipeline_mode = #tpu.pipeline_mode<synchronous>, transform_indices = @transform_8, window_bounds = array<i64: 1, 96>}, {pipeline_mode = #tpu.pipeline_mode<synchronous>, transform_indices = @transform_9, window_bounds = array<i64: 1, 32>}, {pipeline_mode = #tpu.pipeline_mode<synchronous>, transform_indices = @transform_10, window_bounds = array<i64: 32, 5>}, {pipeline_mode = #tpu.pipeline_mode<synchronous>, transform_indices = @transform_11, window_bounds = array<i64: 1, 5>}, {transform_indices = @transform_12, window_bounds = array<i64: 8, 5>}]} {
    %c0 = arith.constant 0 : index
    %c0_0 = arith.constant 0 : index
    %0 = vector.load %arg3[%c0, %c0_0] : memref<16x96xbf16, #tpu.memory_space<vmem>>, vector<16x96xbf16>
    %c0_1 = arith.constant 0 : index
    %c0_2 = arith.constant 0 : index
    %1 = vector.load %arg7[%c0_1, %c0_2] : memref<32x96xbf16, #tpu.memory_space<vmem>>, vector<32x96xbf16>
    %c0_3 = arith.constant 0 : index
    %c0_4 = arith.constant 0 : index
    %2 = vector.load %arg4[%c0_3, %c0_4] : memref<32x96xbf16, #tpu.memory_space<vmem>>, vector<32x96xbf16>
    %c0_5 = arith.constant 0 : index
    %c0_6 = arith.constant 0 : index
    %3 = vector.load %arg8[%c0_5, %c0_6] : memref<32x96xbf16, #tpu.memory_space<vmem>>, vector<32x96xbf16>
    %c0_7 = arith.constant 0 : index
    %c0_8 = arith.constant 0 : index
    %4 = vector.load %arg5[%c0_7, %c0_8] : memref<1x96xf32, #tpu.memory_space<vmem>>, vector<1x96xf32>
    %c0_9 = arith.constant 0 : index
    %c0_10 = arith.constant 0 : index
    %5 = vector.load %arg9[%c0_9, %c0_10] : memref<1x96xf32, #tpu.memory_space<vmem>>, vector<1x96xf32>
    %c0_11 = arith.constant 0 : index
    %c0_12 = arith.constant 0 : index
    %6 = vector.load %arg6[%c0_11, %c0_12] : memref<1x32xf32, #tpu.memory_space<vmem>>, vector<1x32xf32>
    %c0_13 = arith.constant 0 : index
    %c0_14 = arith.constant 0 : index
    %7 = vector.load %arg10[%c0_13, %c0_14] : memref<1x32xf32, #tpu.memory_space<vmem>>, vector<1x32xf32>
    %c0_15 = arith.constant 0 : index
    %c0_16 = arith.constant 0 : index
    %c0_17 = arith.constant 0 : index
    %8 = vector.load %arg1[%c0_15, %c0_16, %c0_17] : memref<8x8x16xbf16, #tpu.memory_space<vmem>>, vector<1x8x16xbf16>
    %9 = vector.shape_cast %8 : vector<1x8x16xbf16> to vector<8x16xbf16>
    %cst = arith.constant dense<0.000000e+00> : vector<8x96xf32>
    %10 = tpu.matmul %9, %0, %cst {dimension_numbers = #tpu.dot_dimension_numbers<[1], [0], [0], [1], [0, 0, 1, 1], [], []>} : vector<8x16xbf16>, vector<16x96xbf16>, vector<8x96xf32> -> vector<8x96xf32>
    %11 = vector.broadcast %4 : vector<1x96xf32> to vector<8x96xf32>
    %12 = arith.addf %10, %11 : vector<8x96xf32>
    %c0_18 = arith.constant 0 : index
    %c0_19 = arith.constant 0 : index
    %c0_20 = arith.constant 0 : index
    %13 = vector.load %arg14[%c0_18, %c0_19, %c0_20] : memref<8x8x96xf32, #tpu.memory_space<vmem>>, vector<1x8x96xf32>
    %14 = vector.shape_cast %13 : vector<1x8x96xf32> to vector<8x96xf32>
    %15 = vector.shape_cast %12 : vector<8x96xf32> to vector<1x8x96xf32>
    tpu.vector_store %arg14[%c0_18, %c0_19, %c0_20], %15 {strides = array<i32>} : memref<8x8x96xf32, #tpu.memory_space<vmem>>, vector<1x8x96xf32>,
    %c1 = arith.constant 1 : index
    %c0_21 = arith.constant 0 : index
    %c0_22 = arith.constant 0 : index
    %16 = vector.load %arg1[%c1, %c0_21, %c0_22] : memref<8x8x16xbf16, #tpu.memory_space<vmem>>, vector<1x8x16xbf16>
    %17 = vector.shape_cast %16 : vector<1x8x16xbf16> to vector<8x16xbf16>
    %cst_23 = arith.constant dense<0.000000e+00> : vector<8x96xf32>
    %18 = tpu.matmul %17, %0, %cst_23 {dimension_numbers = #tpu.dot_dimension_numbers<[1], [0], [0], [1], [0, 0, 1, 1], [], []>} : vector<8x16xbf16>, vector<16x96xbf16>, vector<8x96xf32> -> vector<8x96xf32>
    %19 = vector.broadcast %4 : vector<1x96xf32> to vector<8x96xf32>
    %20 = arith.addf %18, %19 : vector<8x96xf32>
    %c1_24 = arith.constant 1 : index
    %c0_25 = arith.constant 0 : index
    %c0_26 = arith.constant 0 : index
    %21 = vector.load %arg14[%c1_24, %c0_25, %c0_26] : memref<8x8x96xf32, #tpu.memory_space<vmem>>, vector<1x8x96xf32>
    %22 = vector.shape_cast %21 : vector<1x8x96xf32> to vector<8x96xf32>
    %23 = vector.shape_cast %20 : vector<8x96xf32> to vector<1x8x96xf32>
    tpu.vector_store %arg14[%c1_24, %c0_25, %c0_26], %23 {strides = array<i32>} : memref<8x8x96xf32, #tpu.memory_space<vmem>>, vector<1x8x96xf32>,
    %c2 = arith.constant 2 : index
    %c0_27 = arith.constant 0 : index
    %c0_28 = arith.constant 0 : index
    %24 = vector.load %arg1[%c2, %c0_27, %c0_28] : memref<8x8x16xbf16, #tpu.memory_space<vmem>>, vector<1x8x16xbf16>
    %25 = vector.shape_cast %24 : vector<1x8x16xbf16> to vector<8x16xbf16>
    %cst_29 = arith.constant dense<0.000000e+00> : vector<8x96xf32>
    %26 = tpu.matmul %25, %0, %cst_29 {dimension_numbers = #tpu.dot_dimension_numbers<[1], [0], [0], [1], [0, 0, 1, 1], [], []>} : vector<8x16xbf16>, vector<16x96xbf16>, vector<8x96xf32> -> vector<8x96xf32>
    %27 = vector.broadcast %4 : vector<1x96xf32> to vector<8x96xf32>
    %28 = arith.addf %26, %27 : vector<8x96xf32>
    %c2_30 = arith.constant 2 : index
    %c0_31 = arith.constant 0 : index
    %c0_32 = arith.constant 0 : index
    %29 = vector.load %arg14[%c2_30, %c0_31, %c0_32] : memref<8x8x96xf32, #tpu.memory_space<vmem>>, vector<1x8x96xf32>
    %30 = vector.shape_cast %29 : vector<1x8x96xf32> to vector<8x96xf32>
    %31 = vector.shape_cast %28 : vector<8x96xf32> to vector<1x8x96xf32>
    tpu.vector_store %arg14[%c2_30, %c0_31, %c0_32], %31 {strides = array<i32>} : memref<8x8x96xf32, #tpu.memory_space<vmem>>, vector<1x8x96xf32>,
    %c3 = arith.constant 3 : index
    %c0_33 = arith.constant 0 : index
    %c0_34 = arith.constant 0 : index
    %32 = vector.load %arg1[%c3, %c0_33, %c0_34] : memref<8x8x16xbf16, #tpu.memory_space<vmem>>, vector<1x8x16xbf16>
    %33 = vector.shape_cast %32 : vector<1x8x16xbf16> to vector<8x16xbf16>
    %cst_35 = arith.constant dense<0.000000e+00> : vector<8x96xf32>
    %34 = tpu.matmul %33, %0, %cst_35 {dimension_numbers = #tpu.dot_dimension_numbers<[1], [0], [0], [1], [0, 0, 1, 1], [], []>} : vector<8x16xbf16>, vector<16x96xbf16>, vector<8x96xf32> -> vector<8x96xf32>
    %35 = vector.broadcast %4 : vector<1x96xf32> to vector<8x96xf32>
    %36 = arith.addf %34, %35 : vector<8x96xf32>
    %c3_36 = arith.constant 3 : index
    %c0_37 = arith.constant 0 : index
    %c0_38 = arith.constant 0 : index
    %37 = vector.load %arg14[%c3_36, %c0_37, %c0_38] : memref<8x8x96xf32, #tpu.memory_space<vmem>>, vector<1x8x96xf32>
    %38 = vector.shape_cast %37 : vector<1x8x96xf32> to vector<8x96xf32>
    %39 = vector.shape_cast %36 : vector<8x96xf32> to vector<1x8x96xf32>
    tpu.vector_store %arg14[%c3_36, %c0_37, %c0_38], %39 {strides = array<i32>} : memref<8x8x96xf32, #tpu.memory_space<vmem>>, vector<1x8x96xf32>,
    %c4 = arith.constant 4 : index
    %c0_39 = arith.constant 0 : index
    %c0_40 = arith.constant 0 : index
    %40 = vector.load %arg1[%c4, %c0_39, %c0_40] : memref<8x8x16xbf16, #tpu.memory_space<vmem>>, vector<1x8x16xbf16>
    %41 = vector.shape_cast %40 : vector<1x8x16xbf16> to vector<8x16xbf16>
    %cst_41 = arith.constant dense<0.000000e+00> : vector<8x96xf32>
    %42 = tpu.matmul %41, %0, %cst_41 {dimension_numbers = #tpu.dot_dimension_numbers<[1], [0], [0], [1], [0, 0, 1, 1], [], []>} : vector<8x16xbf16>, vector<16x96xbf16>, vector<8x96xf32> -> vector<8x96xf32>
    %43 = vector.broadcast %4 : vector<1x96xf32> to vector<8x96xf32>
    %44 = arith.addf %42, %43 : vector<8x96xf32>
    %c4_42 = arith.constant 4 : index
    %c0_43 = arith.constant 0 : index
    %c0_44 = arith.constant 0 : index
    %45 = vector.load %arg14[%c4_42, %c0_43, %c0_44] : memref<8x8x96xf32, #tpu.memory_space<vmem>>, vector<1x8x96xf32>
    %46 = vector.shape_cast %45 : vector<1x8x96xf32> to vector<8x96xf32>
    %47 = vector.shape_cast %44 : vector<8x96xf32> to vector<1x8x96xf32>
    tpu.vector_store %arg14[%c4_42, %c0_43, %c0_44], %47 {strides = array<i32>} : memref<8x8x96xf32, #tpu.memory_space<vmem>>, vector<1x8x96xf32>,
    %c5 = arith.constant 5 : index
    %c0_45 = arith.constant 0 : index
    %c0_46 = arith.constant 0 : index
    %48 = vector.load %arg1[%c5, %c0_45, %c0_46] : memref<8x8x16xbf16, #tpu.memory_space<vmem>>, vector<1x8x16xbf16>
    %49 = vector.shape_cast %48 : vector<1x8x16xbf16> to vector<8x16xbf16>
    %cst_47 = arith.constant dense<0.000000e+00> : vector<8x96xf32>
    %50 = tpu.matmul %49, %0, %cst_47 {dimension_numbers = #tpu.dot_dimension_numbers<[1], [0], [0], [1], [0, 0, 1, 1], [], []>} : vector<8x16xbf16>, vector<16x96xbf16>, vector<8x96xf32> -> vector<8x96xf32>
    %51 = vector.broadcast %4 : vector<1x96xf32> to vector<8x96xf32>
    %52 = arith.addf %50, %51 : vector<8x96xf32>
    %c5_48 = arith.constant 5 : index
    %c0_49 = arith.constant 0 : index
    %c0_50 = arith.constant 0 : index
    %53 = vector.load %arg14[%c5_48, %c0_49, %c0_50] : memref<8x8x96xf32, #tpu.memory_space<vmem>>, vector<1x8x96xf32>
    %54 = vector.shape_cast %53 : vector<1x8x96xf32> to vector<8x96xf32>
    %55 = vector.shape_cast %52 : vector<8x96xf32> to vector<1x8x96xf32>
    tpu.vector_store %arg14[%c5_48, %c0_49, %c0_50], %55 {strides = array<i32>} : memref<8x8x96xf32, #tpu.memory_space<vmem>>, vector<1x8x96xf32>,
    %c6 = arith.constant 6 : index
    %c0_51 = arith.constant 0 : index
    %c0_52 = arith.constant 0 : index
    %56 = vector.load %arg1[%c6, %c0_51, %c0_52] : memref<8x8x16xbf16, #tpu.memory_space<vmem>>, vector<1x8x16xbf16>
    %57 = vector.shape_cast %56 : vector<1x8x16xbf16> to vector<8x16xbf16>
    %cst_53 = arith.constant dense<0.000000e+00> : vector<8x96xf32>
    %58 = tpu.matmul %57, %0, %cst_53 {dimension_numbers = #tpu.dot_dimension_numbers<[1], [0], [0], [1], [0, 0, 1, 1], [], []>} : vector<8x16xbf16>, vector<16x96xbf16>, vector<8x96xf32> -> vector<8x96xf32>
    %59 = vector.broadcast %4 : vector<1x96xf32> to vector<8x96xf32>
    %60 = arith.addf %58, %59 : vector<8x96xf32>
    %c6_54 = arith.constant 6 : index
    %c0_55 = arith.constant 0 : index
    %c0_56 = arith.constant 0 : index
    %61 = vector.load %arg14[%c6_54, %c0_55, %c0_56] : memref<8x8x96xf32, #tpu.memory_space<vmem>>, vector<1x8x96xf32>
    %62 = vector.shape_cast %61 : vector<1x8x96xf32> to vector<8x96xf32>
    %63 = vector.shape_cast %60 : vector<8x96xf32> to vector<1x8x96xf32>
    tpu.vector_store %arg14[%c6_54, %c0_55, %c0_56], %63 {strides = array<i32>} : memref<8x8x96xf32, #tpu.memory_space<vmem>>, vector<1x8x96xf32>,
    %c7 = arith.constant 7 : index
    %c0_57 = arith.constant 0 : index
    %c0_58 = arith.constant 0 : index
    %64 = vector.load %arg1[%c7, %c0_57, %c0_58] : memref<8x8x16xbf16, #tpu.memory_space<vmem>>, vector<1x8x16xbf16>
    %65 = vector.shape_cast %64 : vector<1x8x16xbf16> to vector<8x16xbf16>
    %cst_59 = arith.constant dense<0.000000e+00> : vector<8x96xf32>
    %66 = tpu.matmul %65, %0, %cst_59 {dimension_numbers = #tpu.dot_dimension_numbers<[1], [0], [0], [1], [0, 0, 1, 1], [], []>} : vector<8x16xbf16>, vector<16x96xbf16>, vector<8x96xf32> -> vector<8x96xf32>
    %67 = vector.broadcast %4 : vector<1x96xf32> to vector<8x96xf32>
    %68 = arith.addf %66, %67 : vector<8x96xf32>
    %c7_60 = arith.constant 7 : index
    %c0_61 = arith.constant 0 : index
    %c0_62 = arith.constant 0 : index
    %69 = vector.load %arg14[%c7_60, %c0_61, %c0_62] : memref<8x8x96xf32, #tpu.memory_space<vmem>>, vector<1x8x96xf32>
    %70 = vector.shape_cast %69 : vector<1x8x96xf32> to vector<8x96xf32>
    %71 = vector.shape_cast %68 : vector<8x96xf32> to vector<1x8x96xf32>
    tpu.vector_store %arg14[%c7_60, %c0_61, %c0_62], %71 {strides = array<i32>} : memref<8x8x96xf32, #tpu.memory_space<vmem>>, vector<1x8x96xf32>,
    %cst_63 = arith.constant 0.000000e+00 : f32
    %72 = vector.broadcast %cst_63 : f32 to vector<8x32xf32>
    %cst_64 = arith.constant 0.000000e+00 : f32
    %73 = vector.broadcast %cst_64 : f32 to vector<8x32xf32>
    %cst_65 = arith.constant 0.000000e+00 : bf16
    %74 = vector.broadcast %cst_65 : bf16 to vector<8x32xbf16>
    %cst_66 = arith.constant 0.000000e+00 : bf16
    %75 = vector.broadcast %cst_66 : bf16 to vector<8x32xbf16>
    %cst_67 = arith.constant 0.000000e+00 : f32
    %76 = vector.broadcast %cst_67 : f32 to vector<8x32xf32>
    %c0_68 = arith.constant 0 : index
    %c0_69 = arith.constant 0 : index
    %77 = vector.load %arg2[%c0_68, %c0_69] : memref<8x1xi32, #tpu.memory_space<vmem>>, vector<8x1xi32>
    %c0_70 = arith.constant 0 : index
    %c0_71 = arith.constant 0 : index
    %c0_72 = arith.constant 0 : index
    %78 = vector.load %arg14[%c0_70, %c0_71, %c0_72] : memref<8x8x96xf32, #tpu.memory_space<vmem>>, vector<1x8x96xf32>
    %79 = vector.shape_cast %78 : vector<1x8x96xf32> to vector<8x96xf32>
    %cst_73 = arith.constant dense<0.000000e+00> : vector<8x96xf32>
    %80 = tpu.matmul %74, %2, %cst_73 {dimension_numbers = #tpu.dot_dimension_numbers<[1], [0], [0], [1], [0, 0, 1, 1], [], []>} : vector<8x32xbf16>, vector<32x96xbf16>, vector<8x96xf32> -> vector<8x96xf32>
    %81 = vector.extract_strided_slice %79 {offsets = [0, 0], sizes = [8, 32], strides = [1, 1]} : vector<8x96xf32> to vector<8x32xf32>
    %82 = vector.extract_strided_slice %80 {offsets = [0, 0], sizes = [8, 32], strides = [1, 1]} : vector<8x96xf32> to vector<8x32xf32>
    %83 = arith.addf %81, %82 : vector<8x32xf32>
    %84 = arith.negf %83 : vector<8x32xf32>
    %85 = math.exp %84 : vector<8x32xf32>
    %cst_74 = arith.constant 1.000000e+00 : f32
    %86 = vector.broadcast %cst_74 : f32 to vector<8x32xf32>
    %87 = arith.addf %86, %85 : vector<8x32xf32>
    %88 = arith.divf %86, %87 : vector<8x32xf32>
    %89 = vector.extract_strided_slice %79 {offsets = [0, 32], sizes = [8, 32], strides = [1, 1]} : vector<8x96xf32> to vector<8x32xf32>
    %90 = vector.extract_strided_slice %80 {offsets = [0, 32], sizes = [8, 32], strides = [1, 1]} : vector<8x96xf32> to vector<8x32xf32>
    %91 = arith.addf %89, %90 : vector<8x32xf32>
    %92 = arith.negf %91 : vector<8x32xf32>
    %93 = math.exp %92 : vector<8x32xf32>
    %cst_75 = arith.constant 1.000000e+00 : f32
    %94 = vector.broadcast %cst_75 : f32 to vector<8x32xf32>
    %95 = arith.addf %94, %93 : vector<8x32xf32>
    %96 = arith.divf %94, %95 : vector<8x32xf32>
    %97 = vector.extract_strided_slice %79 {offsets = [0, 64], sizes = [8, 32], strides = [1, 1]} : vector<8x96xf32> to vector<8x32xf32>
    %98 = vector.extract_strided_slice %80 {offsets = [0, 64], sizes = [8, 32], strides = [1, 1]} : vector<8x96xf32> to vector<8x32xf32>
    %99 = vector.broadcast %6 : vector<1x32xf32> to vector<8x32xf32>
    %100 = arith.addf %98, %99 : vector<8x32xf32>
    %101 = arith.mulf %88, %100 : vector<8x32xf32>
    %102 = arith.addf %97, %101 : vector<8x32xf32>
    %103 = math.tanh %102 : vector<8x32xf32>
    %104 = arith.subf %72, %103 : vector<8x32xf32>
    %105 = arith.mulf %96, %104 : vector<8x32xf32>
    %106 = arith.addf %103, %105 : vector<8x32xf32>
    %107 = arith.truncf %106 : vector<8x32xf32> to vector<8x32xbf16>
    %cst_76 = arith.constant dense<0.000000e+00> : vector<8x96xf32>
    %108 = tpu.matmul %107, %1, %cst_76 {dimension_numbers = #tpu.dot_dimension_numbers<[1], [0], [0], [1], [0, 0, 1, 1], [], []>} : vector<8x32xbf16>, vector<32x96xbf16>, vector<8x96xf32> -> vector<8x96xf32>
    %109 = vector.broadcast %5 : vector<1x96xf32> to vector<8x96xf32>
    %110 = arith.addf %108, %109 : vector<8x96xf32>
    %cst_77 = arith.constant dense<0.000000e+00> : vector<8x96xf32>
    %111 = tpu.matmul %75, %3, %cst_77 {dimension_numbers = #tpu.dot_dimension_numbers<[1], [0], [0], [1], [0, 0, 1, 1], [], []>} : vector<8x32xbf16>, vector<32x96xbf16>, vector<8x96xf32> -> vector<8x96xf32>
    %112 = vector.extract_strided_slice %110 {offsets = [0, 0], sizes = [8, 32], strides = [1, 1]} : vector<8x96xf32> to vector<8x32xf32>
    %113 = vector.extract_strided_slice %111 {offsets = [0, 0], sizes = [8, 32], strides = [1, 1]} : vector<8x96xf32> to vector<8x32xf32>
    %114 = arith.addf %112, %113 : vector<8x32xf32>
    %115 = arith.negf %114 : vector<8x32xf32>
    %116 = math.exp %115 : vector<8x32xf32>
    %cst_78 = arith.constant 1.000000e+00 : f32
    %117 = vector.broadcast %cst_78 : f32 to vector<8x32xf32>
    %118 = arith.addf %117, %116 : vector<8x32xf32>
    %119 = arith.divf %117, %118 : vector<8x32xf32>
    %120 = vector.extract_strided_slice %110 {offsets = [0, 32], sizes = [8, 32], strides = [1, 1]} : vector<8x96xf32> to vector<8x32xf32>
    %121 = vector.extract_strided_slice %111 {offsets = [0, 32], sizes = [8, 32], strides = [1, 1]} : vector<8x96xf32> to vector<8x32xf32>
    %122 = arith.addf %120, %121 : vector<8x32xf32>
    %123 = arith.negf %122 : vector<8x32xf32>
    %124 = math.exp %123 : vector<8x32xf32>
    %cst_79 = arith.constant 1.000000e+00 : f32
    %125 = vector.broadcast %cst_79 : f32 to vector<8x32xf32>
    %126 = arith.addf %125, %124 : vector<8x32xf32>
    %127 = arith.divf %125, %126 : vector<8x32xf32>
    %128 = vector.extract_strided_slice %110 {offsets = [0, 64], sizes = [8, 32], strides = [1, 1]} : vector<8x96xf32> to vector<8x32xf32>
    %129 = vector.extract_strided_slice %111 {offsets = [0, 64], sizes = [8, 32], strides = [1, 1]} : vector<8x96xf32> to vector<8x32xf32>
    %130 = vector.broadcast %7 : vector<1x32xf32> to vector<8x32xf32>
    %131 = arith.addf %129, %130 : vector<8x32xf32>
    %132 = arith.mulf %119, %131 : vector<8x32xf32>
    %133 = arith.addf %128, %132 : vector<8x32xf32>
    %134 = math.tanh %133 : vector<8x32xf32>
    %135 = arith.subf %73, %134 : vector<8x32xf32>
    %136 = arith.mulf %127, %135 : vector<8x32xf32>
    %137 = arith.addf %134, %136 : vector<8x32xf32>
    %138 = arith.truncf %137 : vector<8x32xf32> to vector<8x32xbf16>
    %c1_i32 = arith.constant 1 : i32
    %139 = vector.broadcast %c1_i32 : i32 to vector<8x1xi32>
    %140 = arith.cmpi eq, %77, %139 : vector<8x1xi32>
    %141 = vector.shape_cast %140 : vector<8x1xi1> to vector<8x1xi1>
    %142 = vector.broadcast %141 : vector<8x1xi1> to vector<8x32xi1>
    %143 = arith.select %142, %137, %76 : vector<8x32xi1>, vector<8x32xf32>
    %c1_80 = arith.constant 1 : index
    %c0_81 = arith.constant 0 : index
    %c0_82 = arith.constant 0 : index
    %144 = vector.load %arg14[%c1_80, %c0_81, %c0_82] : memref<8x8x96xf32, #tpu.memory_space<vmem>>, vector<1x8x96xf32>
    %145 = vector.shape_cast %144 : vector<1x8x96xf32> to vector<8x96xf32>
    %cst_83 = arith.constant dense<0.000000e+00> : vector<8x96xf32>
    %146 = tpu.matmul %107, %2, %cst_83 {dimension_numbers = #tpu.dot_dimension_numbers<[1], [0], [0], [1], [0, 0, 1, 1], [], []>} : vector<8x32xbf16>, vector<32x96xbf16>, vector<8x96xf32> -> vector<8x96xf32>
    %147 = vector.extract_strided_slice %145 {offsets = [0, 0], sizes = [8, 32], strides = [1, 1]} : vector<8x96xf32> to vector<8x32xf32>
    %148 = vector.extract_strided_slice %146 {offsets = [0, 0], sizes = [8, 32], strides = [1, 1]} : vector<8x96xf32> to vector<8x32xf32>
    %149 = arith.addf %147, %148 : vector<8x32xf32>
    %150 = arith.negf %149 : vector<8x32xf32>
    %151 = math.exp %150 : vector<8x32xf32>
    %cst_84 = arith.constant 1.000000e+00 : f32
    %152 = vector.broadcast %cst_84 : f32 to vector<8x32xf32>
    %153 = arith.addf %152, %151 : vector<8x32xf32>
    %154 = arith.divf %152, %153 : vector<8x32xf32>
    %155 = vector.extract_strided_slice %145 {offsets = [0, 32], sizes = [8, 32], strides = [1, 1]} : vector<8x96xf32> to vector<8x32xf32>
    %156 = vector.extract_strided_slice %146 {offsets = [0, 32], sizes = [8, 32], strides = [1, 1]} : vector<8x96xf32> to vector<8x32xf32>
    %157 = arith.addf %155, %156 : vector<8x32xf32>
    %158 = arith.negf %157 : vector<8x32xf32>
    %159 = math.exp %158 : vector<8x32xf32>
    %cst_85 = arith.constant 1.000000e+00 : f32
    %160 = vector.broadcast %cst_85 : f32 to vector<8x32xf32>
    %161 = arith.addf %160, %159 : vector<8x32xf32>
    %162 = arith.divf %160, %161 : vector<8x32xf32>
    %163 = vector.extract_strided_slice %145 {offsets = [0, 64], sizes = [8, 32], strides = [1, 1]} : vector<8x96xf32> to vector<8x32xf32>
    %164 = vector.extract_strided_slice %146 {offsets = [0, 64], sizes = [8, 32], strides = [1, 1]} : vector<8x96xf32> to vector<8x32xf32>
    %165 = vector.broadcast %6 : vector<1x32xf32> to vector<8x32xf32>
    %166 = arith.addf %164, %165 : vector<8x32xf32>
    %167 = arith.mulf %154, %166 : vector<8x32xf32>
    %168 = arith.addf %163, %167 : vector<8x32xf32>
    %169 = math.tanh %168 : vector<8x32xf32>
    %170 = arith.subf %106, %169 : vector<8x32xf32>
    %171 = arith.mulf %162, %170 : vector<8x32xf32>
    %172 = arith.addf %169, %171 : vector<8x32xf32>
    %173 = arith.truncf %172 : vector<8x32xf32> to vector<8x32xbf16>
    %cst_86 = arith.constant dense<0.000000e+00> : vector<8x96xf32>
    %174 = tpu.matmul %173, %1, %cst_86 {dimension_numbers = #tpu.dot_dimension_numbers<[1], [0], [0], [1], [0, 0, 1, 1], [], []>} : vector<8x32xbf16>, vector<32x96xbf16>, vector<8x96xf32> -> vector<8x96xf32>
    %175 = vector.broadcast %5 : vector<1x96xf32> to vector<8x96xf32>
    %176 = arith.addf %174, %175 : vector<8x96xf32>
    %cst_87 = arith.constant dense<0.000000e+00> : vector<8x96xf32>
    %177 = tpu.matmul %138, %3, %cst_87 {dimension_numbers = #tpu.dot_dimension_numbers<[1], [0], [0], [1], [0, 0, 1, 1], [], []>} : vector<8x32xbf16>, vector<32x96xbf16>, vector<8x96xf32> -> vector<8x96xf32>
    %178 = vector.extract_strided_slice %176 {offsets = [0, 0], sizes = [8, 32], strides = [1, 1]} : vector<8x96xf32> to vector<8x32xf32>
    %179 = vector.extract_strided_slice %177 {offsets = [0, 0], sizes = [8, 32], strides = [1, 1]} : vector<8x96xf32> to vector<8x32xf32>
    %180 = arith.addf %178, %179 : vector<8x32xf32>
    %181 = arith.negf %180 : vector<8x32xf32>
    %182 = math.exp %181 : vector<8x32xf32>
    %cst_88 = arith.constant 1.000000e+00 : f32
    %183 = vector.broadcast %cst_88 : f32 to vector<8x32xf32>
    %184 = arith.addf %183, %182 : vector<8x32xf32>
    %185 = arith.divf %183, %184 : vector<8x32xf32>
    %186 = vector.extract_strided_slice %176 {offsets = [0, 32], sizes = [8, 32], strides = [1, 1]} : vector<8x96xf32> to vector<8x32xf32>
    %187 = vector.extract_strided_slice %177 {offsets = [0, 32], sizes = [8, 32], strides = [1, 1]} : vector<8x96xf32> to vector<8x32xf32>
    %188 = arith.addf %186, %187 : vector<8x32xf32>
    %189 = arith.negf %188 : vector<8x32xf32>
    %190 = math.exp %189 : vector<8x32xf32>
    %cst_89 = arith.constant 1.000000e+00 : f32
    %191 = vector.broadcast %cst_89 : f32 to vector<8x32xf32>
    %192 = arith.addf %191, %190 : vector<8x32xf32>
    %193 = arith.divf %191, %192 : vector<8x32xf32>
    %194 = vector.extract_strided_slice %176 {offsets = [0, 64], sizes = [8, 32], strides = [1, 1]} : vector<8x96xf32> to vector<8x32xf32>
    %195 = vector.extract_strided_slice %177 {offsets = [0, 64], sizes = [8, 32], strides = [1, 1]} : vector<8x96xf32> to vector<8x32xf32>
    %196 = vector.broadcast %7 : vector<1x32xf32> to vector<8x32xf32>
    %197 = arith.addf %195, %196 : vector<8x32xf32>
    %198 = arith.mulf %185, %197 : vector<8x32xf32>
    %199 = arith.addf %194, %198 : vector<8x32xf32>
    %200 = math.tanh %199 : vector<8x32xf32>
    %201 = arith.subf %137, %200 : vector<8x32xf32>
    %202 = arith.mulf %193, %201 : vector<8x32xf32>
    %203 = arith.addf %200, %202 : vector<8x32xf32>
    %204 = arith.truncf %203 : vector<8x32xf32> to vector<8x32xbf16>
    %c2_i32 = arith.constant 2 : i32
    %205 = vector.broadcast %c2_i32 : i32 to vector<8x1xi32>
    %206 = arith.cmpi eq, %77, %205 : vector<8x1xi32>
    %207 = vector.shape_cast %206 : vector<8x1xi1> to vector<8x1xi1>
    %208 = vector.broadcast %207 : vector<8x1xi1> to vector<8x32xi1>
    %209 = arith.select %208, %203, %143 : vector<8x32xi1>, vector<8x32xf32>
    %c2_90 = arith.constant 2 : index
    %c0_91 = arith.constant 0 : index
    %c0_92 = arith.constant 0 : index
    %210 = vector.load %arg14[%c2_90, %c0_91, %c0_92] : memref<8x8x96xf32, #tpu.memory_space<vmem>>, vector<1x8x96xf32>
    %211 = vector.shape_cast %210 : vector<1x8x96xf32> to vector<8x96xf32>
    %cst_93 = arith.constant dense<0.000000e+00> : vector<8x96xf32>
    %212 = tpu.matmul %173, %2, %cst_93 {dimension_numbers = #tpu.dot_dimension_numbers<[1], [0], [0], [1], [0, 0, 1, 1], [], []>} : vector<8x32xbf16>, vector<32x96xbf16>, vector<8x96xf32> -> vector<8x96xf32>
    %213 = vector.extract_strided_slice %211 {offsets = [0, 0], sizes = [8, 32], strides = [1, 1]} : vector<8x96xf32> to vector<8x32xf32>
    %214 = vector.extract_strided_slice %212 {offsets = [0, 0], sizes = [8, 32], strides = [1, 1]} : vector<8x96xf32> to vector<8x32xf32>
    %215 = arith.addf %213, %214 : vector<8x32xf32>
    %216 = arith.negf %215 : vector<8x32xf32>
    %217 = math.exp %216 : vector<8x32xf32>
    %cst_94 = arith.constant 1.000000e+00 : f32
    %218 = vector.broadcast %cst_94 : f32 to vector<8x32xf32>
    %219 = arith.addf %218, %217 : vector<8x32xf32>
    %220 = arith.divf %218, %219 : vector<8x32xf32>
    %221 = vector.extract_strided_slice %211 {offsets = [0, 32], sizes = [8, 32], strides = [1, 1]} : vector<8x96xf32> to vector<8x32xf32>
    %222 = vector.extract_strided_slice %212 {offsets = [0, 32], sizes = [8, 32], strides = [1, 1]} : vector<8x96xf32> to vector<8x32xf32>
    %223 = arith.addf %221, %222 : vector<8x32xf32>
    %224 = arith.negf %223 : vector<8x32xf32>
    %225 = math.exp %224 : vector<8x32xf32>
    %cst_95 = arith.constant 1.000000e+00 : f32
    %226 = vector.broadcast %cst_95 : f32 to vector<8x32xf32>
    %227 = arith.addf %226, %225 : vector<8x32xf32>
    %228 = arith.divf %226, %227 : vector<8x32xf32>
    %229 = vector.extract_strided_slice %211 {offsets = [0, 64], sizes = [8, 32], strides = [1, 1]} : vector<8x96xf32> to vector<8x32xf32>
    %230 = vector.extract_strided_slice %212 {offsets = [0, 64], sizes = [8, 32], strides = [1, 1]} : vector<8x96xf32> to vector<8x32xf32>
    %231 = vector.broadcast %6 : vector<1x32xf32> to vector<8x32xf32>
    %232 = arith.addf %230, %231 : vector<8x32xf32>
    %233 = arith.mulf %220, %232 : vector<8x32xf32>
    %234 = arith.addf %229, %233 : vector<8x32xf32>
    %235 = math.tanh %234 : vector<8x32xf32>
    %236 = arith.subf %172, %235 : vector<8x32xf32>
    %237 = arith.mulf %228, %236 : vector<8x32xf32>
    %238 = arith.addf %235, %237 : vector<8x32xf32>
    %239 = arith.truncf %238 : vector<8x32xf32> to vector<8x32xbf16>
    %cst_96 = arith.constant dense<0.000000e+00> : vector<8x96xf32>
    %240 = tpu.matmul %239, %1, %cst_96 {dimension_numbers = #tpu.dot_dimension_numbers<[1], [0], [0], [1], [0, 0, 1, 1], [], []>} : vector<8x32xbf16>, vector<32x96xbf16>, vector<8x96xf32> -> vector<8x96xf32>
    %241 = vector.broadcast %5 : vector<1x96xf32> to vector<8x96xf32>
    %242 = arith.addf %240, %241 : vector<8x96xf32>
    %cst_97 = arith.constant dense<0.000000e+00> : vector<8x96xf32>
    %243 = tpu.matmul %204, %3, %cst_97 {dimension_numbers = #tpu.dot_dimension_numbers<[1], [0], [0], [1], [0, 0, 1, 1], [], []>} : vector<8x32xbf16>, vector<32x96xbf16>, vector<8x96xf32> -> vector<8x96xf32>
    %244 = vector.extract_strided_slice %242 {offsets = [0, 0], sizes = [8, 32], strides = [1, 1]} : vector<8x96xf32> to vector<8x32xf32>
    %245 = vector.extract_strided_slice %243 {offsets = [0, 0], sizes = [8, 32], strides = [1, 1]} : vector<8x96xf32> to vector<8x32xf32>
    %246 = arith.addf %244, %245 : vector<8x32xf32>
    %247 = arith.negf %246 : vector<8x32xf32>
    %248 = math.exp %247 : vector<8x32xf32>
    %cst_98 = arith.constant 1.000000e+00 : f32
    %249 = vector.broadcast %cst_98 : f32 to vector<8x32xf32>
    %250 = arith.addf %249, %248 : vector<8x32xf32>
    %251 = arith.divf %249, %250 : vector<8x32xf32>
    %252 = vector.extract_strided_slice %242 {offsets = [0, 32], sizes = [8, 32], strides = [1, 1]} : vector<8x96xf32> to vector<8x32xf32>
    %253 = vector.extract_strided_slice %243 {offsets = [0, 32], sizes = [8, 32], strides = [1, 1]} : vector<8x96xf32> to vector<8x32xf32>
    %254 = arith.addf %252, %253 : vector<8x32xf32>
    %255 = arith.negf %254 : vector<8x32xf32>
    %256 = math.exp %255 : vector<8x32xf32>
    %cst_99 = arith.constant 1.000000e+00 : f32
    %257 = vector.broadcast %cst_99 : f32 to vector<8x32xf32>
    %258 = arith.addf %257, %256 : vector<8x32xf32>
    %259 = arith.divf %257, %258 : vector<8x32xf32>
    %260 = vector.extract_strided_slice %242 {offsets = [0, 64], sizes = [8, 32], strides = [1, 1]} : vector<8x96xf32> to vector<8x32xf32>
    %261 = vector.extract_strided_slice %243 {offsets = [0, 64], sizes = [8, 32], strides = [1, 1]} : vector<8x96xf32> to vector<8x32xf32>
    %262 = vector.broadcast %7 : vector<1x32xf32> to vector<8x32xf32>
    %263 = arith.addf %261, %262 : vector<8x32xf32>
    %264 = arith.mulf %251, %263 : vector<8x32xf32>
    %265 = arith.addf %260, %264 : vector<8x32xf32>
    %266 = math.tanh %265 : vector<8x32xf32>
    %267 = arith.subf %203, %266 : vector<8x32xf32>
    %268 = arith.mulf %259, %267 : vector<8x32xf32>
    %269 = arith.addf %266, %268 : vector<8x32xf32>
    %270 = arith.truncf %269 : vector<8x32xf32> to vector<8x32xbf16>
    %c3_i32 = arith.constant 3 : i32
    %271 = vector.broadcast %c3_i32 : i32 to vector<8x1xi32>
    %272 = arith.cmpi eq, %77, %271 : vector<8x1xi32>
    %273 = vector.shape_cast %272 : vector<8x1xi1> to vector<8x1xi1>
    %274 = vector.broadcast %273 : vector<8x1xi1> to vector<8x32xi1>
    %275 = arith.select %274, %269, %209 : vector<8x32xi1>, vector<8x32xf32>
    %c3_100 = arith.constant 3 : index
    %c0_101 = arith.constant 0 : index
    %c0_102 = arith.constant 0 : index
    %276 = vector.load %arg14[%c3_100, %c0_101, %c0_102] : memref<8x8x96xf32, #tpu.memory_space<vmem>>, vector<1x8x96xf32>
    %277 = vector.shape_cast %276 : vector<1x8x96xf32> to vector<8x96xf32>
    %cst_103 = arith.constant dense<0.000000e+00> : vector<8x96xf32>
    %278 = tpu.matmul %239, %2, %cst_103 {dimension_numbers = #tpu.dot_dimension_numbers<[1], [0], [0], [1], [0, 0, 1, 1], [], []>} : vector<8x32xbf16>, vector<32x96xbf16>, vector<8x96xf32> -> vector<8x96xf32>
    %279 = vector.extract_strided_slice %277 {offsets = [0, 0], sizes = [8, 32], strides = [1, 1]} : vector<8x96xf32> to vector<8x32xf32>
    %280 = vector.extract_strided_slice %278 {offsets = [0, 0], sizes = [8, 32], strides = [1, 1]} : vector<8x96xf32> to vector<8x32xf32>
    %281 = arith.addf %279, %280 : vector<8x32xf32>
    %282 = arith.negf %281 : vector<8x32xf32>
    %283 = math.exp %282 : vector<8x32xf32>
    %cst_104 = arith.constant 1.000000e+00 : f32
    %284 = vector.broadcast %cst_104 : f32 to vector<8x32xf32>
    %285 = arith.addf %284, %283 : vector<8x32xf32>
    %286 = arith.divf %284, %285 : vector<8x32xf32>
    %287 = vector.extract_strided_slice %277 {offsets = [0, 32], sizes = [8, 32], strides = [1, 1]} : vector<8x96xf32> to vector<8x32xf32>
    %288 = vector.extract_strided_slice %278 {offsets = [0, 32], sizes = [8, 32], strides = [1, 1]} : vector<8x96xf32> to vector<8x32xf32>
    %289 = arith.addf %287, %288 : vector<8x32xf32>
    %290 = arith.negf %289 : vector<8x32xf32>
    %291 = math.exp %290 : vector<8x32xf32>
    %cst_105 = arith.constant 1.000000e+00 : f32
    %292 = vector.broadcast %cst_105 : f32 to vector<8x32xf32>
    %293 = arith.addf %292, %291 : vector<8x32xf32>
    %294 = arith.divf %292, %293 : vector<8x32xf32>
    %295 = vector.extract_strided_slice %277 {offsets = [0, 64], sizes = [8, 32], strides = [1, 1]} : vector<8x96xf32> to vector<8x32xf32>
    %296 = vector.extract_strided_slice %278 {offsets = [0, 64], sizes = [8, 32], strides = [1, 1]} : vector<8x96xf32> to vector<8x32xf32>
    %297 = vector.broadcast %6 : vector<1x32xf32> to vector<8x32xf32>
    %298 = arith.addf %296, %297 : vector<8x32xf32>
    %299 = arith.mulf %286, %298 : vector<8x32xf32>
    %300 = arith.addf %295, %299 : vector<8x32xf32>
    %301 = math.tanh %300 : vector<8x32xf32>
    %302 = arith.subf %238, %301 : vector<8x32xf32>
    %303 = arith.mulf %294, %302 : vector<8x32xf32>
    %304 = arith.addf %301, %303 : vector<8x32xf32>
    %305 = arith.truncf %304 : vector<8x32xf32> to vector<8x32xbf16>
    %cst_106 = arith.constant dense<0.000000e+00> : vector<8x96xf32>
    %306 = tpu.matmul %305, %1, %cst_106 {dimension_numbers = #tpu.dot_dimension_numbers<[1], [0], [0], [1], [0, 0, 1, 1], [], []>} : vector<8x32xbf16>, vector<32x96xbf16>, vector<8x96xf32> -> vector<8x96xf32>
    %307 = vector.broadcast %5 : vector<1x96xf32> to vector<8x96xf32>
    %308 = arith.addf %306, %307 : vector<8x96xf32>
    %cst_107 = arith.constant dense<0.000000e+00> : vector<8x96xf32>
    %309 = tpu.matmul %270, %3, %cst_107 {dimension_numbers = #tpu.dot_dimension_numbers<[1], [0], [0], [1], [0, 0, 1, 1], [], []>} : vector<8x32xbf16>, vector<32x96xbf16>, vector<8x96xf32> -> vector<8x96xf32>
    %310 = vector.extract_strided_slice %308 {offsets = [0, 0], sizes = [8, 32], strides = [1, 1]} : vector<8x96xf32> to vector<8x32xf32>
    %311 = vector.extract_strided_slice %309 {offsets = [0, 0], sizes = [8, 32], strides = [1, 1]} : vector<8x96xf32> to vector<8x32xf32>
    %312 = arith.addf %310, %311 : vector<8x32xf32>
    %313 = arith.negf %312 : vector<8x32xf32>
    %314 = math.exp %313 : vector<8x32xf32>
    %cst_108 = arith.constant 1.000000e+00 : f32
    %315 = vector.broadcast %cst_108 : f32 to vector<8x32xf32>
    %316 = arith.addf %315, %314 : vector<8x32xf32>
    %317 = arith.divf %315, %316 : vector<8x32xf32>
    %318 = vector.extract_strided_slice %308 {offsets = [0, 32], sizes = [8, 32], strides = [1, 1]} : vector<8x96xf32> to vector<8x32xf32>
    %319 = vector.extract_strided_slice %309 {offsets = [0, 32], sizes = [8, 32], strides = [1, 1]} : vector<8x96xf32> to vector<8x32xf32>
    %320 = arith.addf %318, %319 : vector<8x32xf32>
    %321 = arith.negf %320 : vector<8x32xf32>
    %322 = math.exp %321 : vector<8x32xf32>
    %cst_109 = arith.constant 1.000000e+00 : f32
    %323 = vector.broadcast %cst_109 : f32 to vector<8x32xf32>
    %324 = arith.addf %323, %322 : vector<8x32xf32>
    %325 = arith.divf %323, %324 : vector<8x32xf32>
    %326 = vector.extract_strided_slice %308 {offsets = [0, 64], sizes = [8, 32], strides = [1, 1]} : vector<8x96xf32> to vector<8x32xf32>
    %327 = vector.extract_strided_slice %309 {offsets = [0, 64], sizes = [8, 32], strides = [1, 1]} : vector<8x96xf32> to vector<8x32xf32>
    %328 = vector.broadcast %7 : vector<1x32xf32> to vector<8x32xf32>
    %329 = arith.addf %327, %328 : vector<8x32xf32>
    %330 = arith.mulf %317, %329 : vector<8x32xf32>
    %331 = arith.addf %326, %330 : vector<8x32xf32>
    %332 = math.tanh %331 : vector<8x32xf32>
    %333 = arith.subf %269, %332 : vector<8x32xf32>
    %334 = arith.mulf %325, %333 : vector<8x32xf32>
    %335 = arith.addf %332, %334 : vector<8x32xf32>
    %336 = arith.truncf %335 : vector<8x32xf32> to vector<8x32xbf16>
    %c4_i32 = arith.constant 4 : i32
    %337 = vector.broadcast %c4_i32 : i32 to vector<8x1xi32>
    %338 = arith.cmpi eq, %77, %337 : vector<8x1xi32>
    %339 = vector.shape_cast %338 : vector<8x1xi1> to vector<8x1xi1>
    %340 = vector.broadcast %339 : vector<8x1xi1> to vector<8x32xi1>
    %341 = arith.select %340, %335, %275 : vector<8x32xi1>, vector<8x32xf32>
    %c4_110 = arith.constant 4 : index
    %c0_111 = arith.constant 0 : index
    %c0_112 = arith.constant 0 : index
    %342 = vector.load %arg14[%c4_110, %c0_111, %c0_112] : memref<8x8x96xf32, #tpu.memory_space<vmem>>, vector<1x8x96xf32>
    %343 = vector.shape_cast %342 : vector<1x8x96xf32> to vector<8x96xf32>
    %cst_113 = arith.constant dense<0.000000e+00> : vector<8x96xf32>
    %344 = tpu.matmul %305, %2, %cst_113 {dimension_numbers = #tpu.dot_dimension_numbers<[1], [0], [0], [1], [0, 0, 1, 1], [], []>} : vector<8x32xbf16>, vector<32x96xbf16>, vector<8x96xf32> -> vector<8x96xf32>
    %345 = vector.extract_strided_slice %343 {offsets = [0, 0], sizes = [8, 32], strides = [1, 1]} : vector<8x96xf32> to vector<8x32xf32>
    %346 = vector.extract_strided_slice %344 {offsets = [0, 0], sizes = [8, 32], strides = [1, 1]} : vector<8x96xf32> to vector<8x32xf32>
    %347 = arith.addf %345, %346 : vector<8x32xf32>
    %348 = arith.negf %347 : vector<8x32xf32>
    %349 = math.exp %348 : vector<8x32xf32>
    %cst_114 = arith.constant 1.000000e+00 : f32
    %350 = vector.broadcast %cst_114 : f32 to vector<8x32xf32>
    %351 = arith.addf %350, %349 : vector<8x32xf32>
    %352 = arith.divf %350, %351 : vector<8x32xf32>
    %353 = vector.extract_strided_slice %343 {offsets = [0, 32], sizes = [8, 32], strides = [1, 1]} : vector<8x96xf32> to vector<8x32xf32>
    %354 = vector.extract_strided_slice %344 {offsets = [0, 32], sizes = [8, 32], strides = [1, 1]} : vector<8x96xf32> to vector<8x32xf32>
    %355 = arith.addf %353, %354 : vector<8x32xf32>
    %356 = arith.negf %355 : vector<8x32xf32>
    %357 = math.exp %356 : vector<8x32xf32>
    %cst_115 = arith.constant 1.000000e+00 : f32
    %358 = vector.broadcast %cst_115 : f32 to vector<8x32xf32>
    %359 = arith.addf %358, %357 : vector<8x32xf32>
    %360 = arith.divf %358, %359 : vector<8x32xf32>
    %361 = vector.extract_strided_slice %343 {offsets = [0, 64], sizes = [8, 32], strides = [1, 1]} : vector<8x96xf32> to vector<8x32xf32>
    %362 = vector.extract_strided_slice %344 {offsets = [0, 64], sizes = [8, 32], strides = [1, 1]} : vector<8x96xf32> to vector<8x32xf32>
    %363 = vector.broadcast %6 : vector<1x32xf32> to vector<8x32xf32>
    %364 = arith.addf %362, %363 : vector<8x32xf32>
    %365 = arith.mulf %352, %364 : vector<8x32xf32>
    %366 = arith.addf %361, %365 : vector<8x32xf32>
    %367 = math.tanh %366 : vector<8x32xf32>
    %368 = arith.subf %304, %367 : vector<8x32xf32>
    %369 = arith.mulf %360, %368 : vector<8x32xf32>
    %370 = arith.addf %367, %369 : vector<8x32xf32>
    %371 = arith.truncf %370 : vector<8x32xf32> to vector<8x32xbf16>
    %cst_116 = arith.constant dense<0.000000e+00> : vector<8x96xf32>
    %372 = tpu.matmul %371, %1, %cst_116 {dimension_numbers = #tpu.dot_dimension_numbers<[1], [0], [0], [1], [0, 0, 1, 1], [], []>} : vector<8x32xbf16>, vector<32x96xbf16>, vector<8x96xf32> -> vector<8x96xf32>
    %373 = vector.broadcast %5 : vector<1x96xf32> to vector<8x96xf32>
    %374 = arith.addf %372, %373 : vector<8x96xf32>
    %cst_117 = arith.constant dense<0.000000e+00> : vector<8x96xf32>
    %375 = tpu.matmul %336, %3, %cst_117 {dimension_numbers = #tpu.dot_dimension_numbers<[1], [0], [0], [1], [0, 0, 1, 1], [], []>} : vector<8x32xbf16>, vector<32x96xbf16>, vector<8x96xf32> -> vector<8x96xf32>
    %376 = vector.extract_strided_slice %374 {offsets = [0, 0], sizes = [8, 32], strides = [1, 1]} : vector<8x96xf32> to vector<8x32xf32>
    %377 = vector.extract_strided_slice %375 {offsets = [0, 0], sizes = [8, 32], strides = [1, 1]} : vector<8x96xf32> to vector<8x32xf32>
    %378 = arith.addf %376, %377 : vector<8x32xf32>
    %379 = arith.negf %378 : vector<8x32xf32>
    %380 = math.exp %379 : vector<8x32xf32>
    %cst_118 = arith.constant 1.000000e+00 : f32
    %381 = vector.broadcast %cst_118 : f32 to vector<8x32xf32>
    %382 = arith.addf %381, %380 : vector<8x32xf32>
    %383 = arith.divf %381, %382 : vector<8x32xf32>
    %384 = vector.extract_strided_slice %374 {offsets = [0, 32], sizes = [8, 32], strides = [1, 1]} : vector<8x96xf32> to vector<8x32xf32>
    %385 = vector.extract_strided_slice %375 {offsets = [0, 32], sizes = [8, 32], strides = [1, 1]} : vector<8x96xf32> to vector<8x32xf32>
    %386 = arith.addf %384, %385 : vector<8x32xf32>
    %387 = arith.negf %386 : vector<8x32xf32>
    %388 = math.exp %387 : vector<8x32xf32>
    %cst_119 = arith.constant 1.000000e+00 : f32
    %389 = vector.broadcast %cst_119 : f32 to vector<8x32xf32>
    %390 = arith.addf %389, %388 : vector<8x32xf32>
    %391 = arith.divf %389, %390 : vector<8x32xf32>
    %392 = vector.extract_strided_slice %374 {offsets = [0, 64], sizes = [8, 32], strides = [1, 1]} : vector<8x96xf32> to vector<8x32xf32>
    %393 = vector.extract_strided_slice %375 {offsets = [0, 64], sizes = [8, 32], strides = [1, 1]} : vector<8x96xf32> to vector<8x32xf32>
    %394 = vector.broadcast %7 : vector<1x32xf32> to vector<8x32xf32>
    %395 = arith.addf %393, %394 : vector<8x32xf32>
    %396 = arith.mulf %383, %395 : vector<8x32xf32>
    %397 = arith.addf %392, %396 : vector<8x32xf32>
    %398 = math.tanh %397 : vector<8x32xf32>
    %399 = arith.subf %335, %398 : vector<8x32xf32>
    %400 = arith.mulf %391, %399 : vector<8x32xf32>
    %401 = arith.addf %398, %400 : vector<8x32xf32>
    %402 = arith.truncf %401 : vector<8x32xf32> to vector<8x32xbf16>
    %c5_i32 = arith.constant 5 : i32
    %403 = vector.broadcast %c5_i32 : i32 to vector<8x1xi32>
    %404 = arith.cmpi eq, %77, %403 : vector<8x1xi32>
    %405 = vector.shape_cast %404 : vector<8x1xi1> to vector<8x1xi1>
    %406 = vector.broadcast %405 : vector<8x1xi1> to vector<8x32xi1>
    %407 = arith.select %406, %401, %341 : vector<8x32xi1>, vector<8x32xf32>
    %c5_120 = arith.constant 5 : index
    %c0_121 = arith.constant 0 : index
    %c0_122 = arith.constant 0 : index
    %408 = vector.load %arg14[%c5_120, %c0_121, %c0_122] : memref<8x8x96xf32, #tpu.memory_space<vmem>>, vector<1x8x96xf32>
    %409 = vector.shape_cast %408 : vector<1x8x96xf32> to vector<8x96xf32>
    %cst_123 = arith.constant dense<0.000000e+00> : vector<8x96xf32>
    %410 = tpu.matmul %371, %2, %cst_123 {dimension_numbers = #tpu.dot_dimension_numbers<[1], [0], [0], [1], [0, 0, 1, 1], [], []>} : vector<8x32xbf16>, vector<32x96xbf16>, vector<8x96xf32> -> vector<8x96xf32>
    %411 = vector.extract_strided_slice %409 {offsets = [0, 0], sizes = [8, 32], strides = [1, 1]} : vector<8x96xf32> to vector<8x32xf32>
    %412 = vector.extract_strided_slice %410 {offsets = [0, 0], sizes = [8, 32], strides = [1, 1]} : vector<8x96xf32> to vector<8x32xf32>
    %413 = arith.addf %411, %412 : vector<8x32xf32>
    %414 = arith.negf %413 : vector<8x32xf32>
    %415 = math.exp %414 : vector<8x32xf32>
    %cst_124 = arith.constant 1.000000e+00 : f32
    %416 = vector.broadcast %cst_124 : f32 to vector<8x32xf32>
    %417 = arith.addf %416, %415 : vector<8x32xf32>
    %418 = arith.divf %416, %417 : vector<8x32xf32>
    %419 = vector.extract_strided_slice %409 {offsets = [0, 32], sizes = [8, 32], strides = [1, 1]} : vector<8x96xf32> to vector<8x32xf32>
    %420 = vector.extract_strided_slice %410 {offsets = [0, 32], sizes = [8, 32], strides = [1, 1]} : vector<8x96xf32> to vector<8x32xf32>
    %421 = arith.addf %419, %420 : vector<8x32xf32>
    %422 = arith.negf %421 : vector<8x32xf32>
    %423 = math.exp %422 : vector<8x32xf32>
    %cst_125 = arith.constant 1.000000e+00 : f32
    %424 = vector.broadcast %cst_125 : f32 to vector<8x32xf32>
    %425 = arith.addf %424, %423 : vector<8x32xf32>
    %426 = arith.divf %424, %425 : vector<8x32xf32>
    %427 = vector.extract_strided_slice %409 {offsets = [0, 64], sizes = [8, 32], strides = [1, 1]} : vector<8x96xf32> to vector<8x32xf32>
    %428 = vector.extract_strided_slice %410 {offsets = [0, 64], sizes = [8, 32], strides = [1, 1]} : vector<8x96xf32> to vector<8x32xf32>
    %429 = vector.broadcast %6 : vector<1x32xf32> to vector<8x32xf32>
    %430 = arith.addf %428, %429 : vector<8x32xf32>
    %431 = arith.mulf %418, %430 : vector<8x32xf32>
    %432 = arith.addf %427, %431 : vector<8x32xf32>
    %433 = math.tanh %432 : vector<8x32xf32>
    %434 = arith.subf %370, %433 : vector<8x32xf32>
    %435 = arith.mulf %426, %434 : vector<8x32xf32>
    %436 = arith.addf %433, %435 : vector<8x32xf32>
    %437 = arith.truncf %436 : vector<8x32xf32> to vector<8x32xbf16>
    %cst_126 = arith.constant dense<0.000000e+00> : vector<8x96xf32>
    %438 = tpu.matmul %437, %1, %cst_126 {dimension_numbers = #tpu.dot_dimension_numbers<[1], [0], [0], [1], [0, 0, 1, 1], [], []>} : vector<8x32xbf16>, vector<32x96xbf16>, vector<8x96xf32> -> vector<8x96xf32>
    %439 = vector.broadcast %5 : vector<1x96xf32> to vector<8x96xf32>
    %440 = arith.addf %438, %439 : vector<8x96xf32>
    %cst_127 = arith.constant dense<0.000000e+00> : vector<8x96xf32>
    %441 = tpu.matmul %402, %3, %cst_127 {dimension_numbers = #tpu.dot_dimension_numbers<[1], [0], [0], [1], [0, 0, 1, 1], [], []>} : vector<8x32xbf16>, vector<32x96xbf16>, vector<8x96xf32> -> vector<8x96xf32>
    %442 = vector.extract_strided_slice %440 {offsets = [0, 0], sizes = [8, 32], strides = [1, 1]} : vector<8x96xf32> to vector<8x32xf32>
    %443 = vector.extract_strided_slice %441 {offsets = [0, 0], sizes = [8, 32], strides = [1, 1]} : vector<8x96xf32> to vector<8x32xf32>
    %444 = arith.addf %442, %443 : vector<8x32xf32>
    %445 = arith.negf %444 : vector<8x32xf32>
    %446 = math.exp %445 : vector<8x32xf32>
    %cst_128 = arith.constant 1.000000e+00 : f32
    %447 = vector.broadcast %cst_128 : f32 to vector<8x32xf32>
    %448 = arith.addf %447, %446 : vector<8x32xf32>
    %449 = arith.divf %447, %448 : vector<8x32xf32>
    %450 = vector.extract_strided_slice %440 {offsets = [0, 32], sizes = [8, 32], strides = [1, 1]} : vector<8x96xf32> to vector<8x32xf32>
    %451 = vector.extract_strided_slice %441 {offsets = [0, 32], sizes = [8, 32], strides = [1, 1]} : vector<8x96xf32> to vector<8x32xf32>
    %452 = arith.addf %450, %451 : vector<8x32xf32>
    %453 = arith.negf %452 : vector<8x32xf32>
    %454 = math.exp %453 : vector<8x32xf32>
    %cst_129 = arith.constant 1.000000e+00 : f32
    %455 = vector.broadcast %cst_129 : f32 to vector<8x32xf32>
    %456 = arith.addf %455, %454 : vector<8x32xf32>
    %457 = arith.divf %455, %456 : vector<8x32xf32>
    %458 = vector.extract_strided_slice %440 {offsets = [0, 64], sizes = [8, 32], strides = [1, 1]} : vector<8x96xf32> to vector<8x32xf32>
    %459 = vector.extract_strided_slice %441 {offsets = [0, 64], sizes = [8, 32], strides = [1, 1]} : vector<8x96xf32> to vector<8x32xf32>
    %460 = vector.broadcast %7 : vector<1x32xf32> to vector<8x32xf32>
    %461 = arith.addf %459, %460 : vector<8x32xf32>
    %462 = arith.mulf %449, %461 : vector<8x32xf32>
    %463 = arith.addf %458, %462 : vector<8x32xf32>
    %464 = math.tanh %463 : vector<8x32xf32>
    %465 = arith.subf %401, %464 : vector<8x32xf32>
    %466 = arith.mulf %457, %465 : vector<8x32xf32>
    %467 = arith.addf %464, %466 : vector<8x32xf32>
    %468 = arith.truncf %467 : vector<8x32xf32> to vector<8x32xbf16>
    %c6_i32 = arith.constant 6 : i32
    %469 = vector.broadcast %c6_i32 : i32 to vector<8x1xi32>
    %470 = arith.cmpi eq, %77, %469 : vector<8x1xi32>
    %471 = vector.shape_cast %470 : vector<8x1xi1> to vector<8x1xi1>
    %472 = vector.broadcast %471 : vector<8x1xi1> to vector<8x32xi1>
    %473 = arith.select %472, %467, %407 : vector<8x32xi1>, vector<8x32xf32>
    %c6_130 = arith.constant 6 : index
    %c0_131 = arith.constant 0 : index
    %c0_132 = arith.constant 0 : index
    %474 = vector.load %arg14[%c6_130, %c0_131, %c0_132] : memref<8x8x96xf32, #tpu.memory_space<vmem>>, vector<1x8x96xf32>
    %475 = vector.shape_cast %474 : vector<1x8x96xf32> to vector<8x96xf32>
    %cst_133 = arith.constant dense<0.000000e+00> : vector<8x96xf32>
    %476 = tpu.matmul %437, %2, %cst_133 {dimension_numbers = #tpu.dot_dimension_numbers<[1], [0], [0], [1], [0, 0, 1, 1], [], []>} : vector<8x32xbf16>, vector<32x96xbf16>, vector<8x96xf32> -> vector<8x96xf32>
    %477 = vector.extract_strided_slice %475 {offsets = [0, 0], sizes = [8, 32], strides = [1, 1]} : vector<8x96xf32> to vector<8x32xf32>
    %478 = vector.extract_strided_slice %476 {offsets = [0, 0], sizes = [8, 32], strides = [1, 1]} : vector<8x96xf32> to vector<8x32xf32>
    %479 = arith.addf %477, %478 : vector<8x32xf32>
    %480 = arith.negf %479 : vector<8x32xf32>
    %481 = math.exp %480 : vector<8x32xf32>
    %cst_134 = arith.constant 1.000000e+00 : f32
    %482 = vector.broadcast %cst_134 : f32 to vector<8x32xf32>
    %483 = arith.addf %482, %481 : vector<8x32xf32>
    %484 = arith.divf %482, %483 : vector<8x32xf32>
    %485 = vector.extract_strided_slice %475 {offsets = [0, 32], sizes = [8, 32], strides = [1, 1]} : vector<8x96xf32> to vector<8x32xf32>
    %486 = vector.extract_strided_slice %476 {offsets = [0, 32], sizes = [8, 32], strides = [1, 1]} : vector<8x96xf32> to vector<8x32xf32>
    %487 = arith.addf %485, %486 : vector<8x32xf32>
    %488 = arith.negf %487 : vector<8x32xf32>
    %489 = math.exp %488 : vector<8x32xf32>
    %cst_135 = arith.constant 1.000000e+00 : f32
    %490 = vector.broadcast %cst_135 : f32 to vector<8x32xf32>
    %491 = arith.addf %490, %489 : vector<8x32xf32>
    %492 = arith.divf %490, %491 : vector<8x32xf32>
    %493 = vector.extract_strided_slice %475 {offsets = [0, 64], sizes = [8, 32], strides = [1, 1]} : vector<8x96xf32> to vector<8x32xf32>
    %494 = vector.extract_strided_slice %476 {offsets = [0, 64], sizes = [8, 32], strides = [1, 1]} : vector<8x96xf32> to vector<8x32xf32>
    %495 = vector.broadcast %6 : vector<1x32xf32> to vector<8x32xf32>
    %496 = arith.addf %494, %495 : vector<8x32xf32>
    %497 = arith.mulf %484, %496 : vector<8x32xf32>
    %498 = arith.addf %493, %497 : vector<8x32xf32>
    %499 = math.tanh %498 : vector<8x32xf32>
    %500 = arith.subf %436, %499 : vector<8x32xf32>
    %501 = arith.mulf %492, %500 : vector<8x32xf32>
    %502 = arith.addf %499, %501 : vector<8x32xf32>
    %503 = arith.truncf %502 : vector<8x32xf32> to vector<8x32xbf16>
    %cst_136 = arith.constant dense<0.000000e+00> : vector<8x96xf32>
    %504 = tpu.matmul %503, %1, %cst_136 {dimension_numbers = #tpu.dot_dimension_numbers<[1], [0], [0], [1], [0, 0, 1, 1], [], []>} : vector<8x32xbf16>, vector<32x96xbf16>, vector<8x96xf32> -> vector<8x96xf32>
    %505 = vector.broadcast %5 : vector<1x96xf32> to vector<8x96xf32>
    %506 = arith.addf %504, %505 : vector<8x96xf32>
    %cst_137 = arith.constant dense<0.000000e+00> : vector<8x96xf32>
    %507 = tpu.matmul %468, %3, %cst_137 {dimension_numbers = #tpu.dot_dimension_numbers<[1], [0], [0], [1], [0, 0, 1, 1], [], []>} : vector<8x32xbf16>, vector<32x96xbf16>, vector<8x96xf32> -> vector<8x96xf32>
    %508 = vector.extract_strided_slice %506 {offsets = [0, 0], sizes = [8, 32], strides = [1, 1]} : vector<8x96xf32> to vector<8x32xf32>
    %509 = vector.extract_strided_slice %507 {offsets = [0, 0], sizes = [8, 32], strides = [1, 1]} : vector<8x96xf32> to vector<8x32xf32>
    %510 = arith.addf %508, %509 : vector<8x32xf32>
    %511 = arith.negf %510 : vector<8x32xf32>
    %512 = math.exp %511 : vector<8x32xf32>
    %cst_138 = arith.constant 1.000000e+00 : f32
    %513 = vector.broadcast %cst_138 : f32 to vector<8x32xf32>
    %514 = arith.addf %513, %512 : vector<8x32xf32>
    %515 = arith.divf %513, %514 : vector<8x32xf32>
    %516 = vector.extract_strided_slice %506 {offsets = [0, 32], sizes = [8, 32], strides = [1, 1]} : vector<8x96xf32> to vector<8x32xf32>
    %517 = vector.extract_strided_slice %507 {offsets = [0, 32], sizes = [8, 32], strides = [1, 1]} : vector<8x96xf32> to vector<8x32xf32>
    %518 = arith.addf %516, %517 : vector<8x32xf32>
    %519 = arith.negf %518 : vector<8x32xf32>
    %520 = math.exp %519 : vector<8x32xf32>
    %cst_139 = arith.constant 1.000000e+00 : f32
    %521 = vector.broadcast %cst_139 : f32 to vector<8x32xf32>
    %522 = arith.addf %521, %520 : vector<8x32xf32>
    %523 = arith.divf %521, %522 : vector<8x32xf32>
    %524 = vector.extract_strided_slice %506 {offsets = [0, 64], sizes = [8, 32], strides = [1, 1]} : vector<8x96xf32> to vector<8x32xf32>
    %525 = vector.extract_strided_slice %507 {offsets = [0, 64], sizes = [8, 32], strides = [1, 1]} : vector<8x96xf32> to vector<8x32xf32>
    %526 = vector.broadcast %7 : vector<1x32xf32> to vector<8x32xf32>
    %527 = arith.addf %525, %526 : vector<8x32xf32>
    %528 = arith.mulf %515, %527 : vector<8x32xf32>
    %529 = arith.addf %524, %528 : vector<8x32xf32>
    %530 = math.tanh %529 : vector<8x32xf32>
    %531 = arith.subf %467, %530 : vector<8x32xf32>
    %532 = arith.mulf %523, %531 : vector<8x32xf32>
    %533 = arith.addf %530, %532 : vector<8x32xf32>
    %534 = arith.truncf %533 : vector<8x32xf32> to vector<8x32xbf16>
    %c7_i32 = arith.constant 7 : i32
    %535 = vector.broadcast %c7_i32 : i32 to vector<8x1xi32>
    %536 = arith.cmpi eq, %77, %535 : vector<8x1xi32>
    %537 = vector.shape_cast %536 : vector<8x1xi1> to vector<8x1xi1>
    %538 = vector.broadcast %537 : vector<8x1xi1> to vector<8x32xi1>
    %539 = arith.select %538, %533, %473 : vector<8x32xi1>, vector<8x32xf32>
    %c7_140 = arith.constant 7 : index
    %c0_141 = arith.constant 0 : index
    %c0_142 = arith.constant 0 : index
    %540 = vector.load %arg14[%c7_140, %c0_141, %c0_142] : memref<8x8x96xf32, #tpu.memory_space<vmem>>, vector<1x8x96xf32>
    %541 = vector.shape_cast %540 : vector<1x8x96xf32> to vector<8x96xf32>
    %cst_143 = arith.constant dense<0.000000e+00> : vector<8x96xf32>
    %542 = tpu.matmul %503, %2, %cst_143 {dimension_numbers = #tpu.dot_dimension_numbers<[1], [0], [0], [1], [0, 0, 1, 1], [], []>} : vector<8x32xbf16>, vector<32x96xbf16>, vector<8x96xf32> -> vector<8x96xf32>
    %543 = vector.extract_strided_slice %541 {offsets = [0, 0], sizes = [8, 32], strides = [1, 1]} : vector<8x96xf32> to vector<8x32xf32>
    %544 = vector.extract_strided_slice %542 {offsets = [0, 0], sizes = [8, 32], strides = [1, 1]} : vector<8x96xf32> to vector<8x32xf32>
    %545 = arith.addf %543, %544 : vector<8x32xf32>
    %546 = arith.negf %545 : vector<8x32xf32>
    %547 = math.exp %546 : vector<8x32xf32>
    %cst_144 = arith.constant 1.000000e+00 : f32
    %548 = vector.broadcast %cst_144 : f32 to vector<8x32xf32>
    %549 = arith.addf %548, %547 : vector<8x32xf32>
    %550 = arith.divf %548, %549 : vector<8x32xf32>
    %551 = vector.extract_strided_slice %541 {offsets = [0, 32], sizes = [8, 32], strides = [1, 1]} : vector<8x96xf32> to vector<8x32xf32>
    %552 = vector.extract_strided_slice %542 {offsets = [0, 32], sizes = [8, 32], strides = [1, 1]} : vector<8x96xf32> to vector<8x32xf32>
    %553 = arith.addf %551, %552 : vector<8x32xf32>
    %554 = arith.negf %553 : vector<8x32xf32>
    %555 = math.exp %554 : vector<8x32xf32>
    %cst_145 = arith.constant 1.000000e+00 : f32
    %556 = vector.broadcast %cst_145 : f32 to vector<8x32xf32>
    %557 = arith.addf %556, %555 : vector<8x32xf32>
    %558 = arith.divf %556, %557 : vector<8x32xf32>
    %559 = vector.extract_strided_slice %541 {offsets = [0, 64], sizes = [8, 32], strides = [1, 1]} : vector<8x96xf32> to vector<8x32xf32>
    %560 = vector.extract_strided_slice %542 {offsets = [0, 64], sizes = [8, 32], strides = [1, 1]} : vector<8x96xf32> to vector<8x32xf32>
    %561 = vector.broadcast %6 : vector<1x32xf32> to vector<8x32xf32>
    %562 = arith.addf %560, %561 : vector<8x32xf32>
    %563 = arith.mulf %550, %562 : vector<8x32xf32>
    %564 = arith.addf %559, %563 : vector<8x32xf32>
    %565 = math.tanh %564 : vector<8x32xf32>
    %566 = arith.subf %502, %565 : vector<8x32xf32>
    %567 = arith.mulf %558, %566 : vector<8x32xf32>
    %568 = arith.addf %565, %567 : vector<8x32xf32>
    %569 = arith.truncf %568 : vector<8x32xf32> to vector<8x32xbf16>
    %cst_146 = arith.constant dense<0.000000e+00> : vector<8x96xf32>
    %570 = tpu.matmul %569, %1, %cst_146 {dimension_numbers = #tpu.dot_dimension_numbers<[1], [0], [0], [1], [0, 0, 1, 1], [], []>} : vector<8x32xbf16>, vector<32x96xbf16>, vector<8x96xf32> -> vector<8x96xf32>
    %571 = vector.broadcast %5 : vector<1x96xf32> to vector<8x96xf32>
    %572 = arith.addf %570, %571 : vector<8x96xf32>
    %cst_147 = arith.constant dense<0.000000e+00> : vector<8x96xf32>
    %573 = tpu.matmul %534, %3, %cst_147 {dimension_numbers = #tpu.dot_dimension_numbers<[1], [0], [0], [1], [0, 0, 1, 1], [], []>} : vector<8x32xbf16>, vector<32x96xbf16>, vector<8x96xf32> -> vector<8x96xf32>
    %574 = vector.extract_strided_slice %572 {offsets = [0, 0], sizes = [8, 32], strides = [1, 1]} : vector<8x96xf32> to vector<8x32xf32>
    %575 = vector.extract_strided_slice %573 {offsets = [0, 0], sizes = [8, 32], strides = [1, 1]} : vector<8x96xf32> to vector<8x32xf32>
    %576 = arith.addf %574, %575 : vector<8x32xf32>
    %577 = arith.negf %576 : vector<8x32xf32>
    %578 = math.exp %577 : vector<8x32xf32>
    %cst_148 = arith.constant 1.000000e+00 : f32
    %579 = vector.broadcast %cst_148 : f32 to vector<8x32xf32>
    %580 = arith.addf %579, %578 : vector<8x32xf32>
    %581 = arith.divf %579, %580 : vector<8x32xf32>
    %582 = vector.extract_strided_slice %572 {offsets = [0, 32], sizes = [8, 32], strides = [1, 1]} : vector<8x96xf32> to vector<8x32xf32>
    %583 = vector.extract_strided_slice %573 {offsets = [0, 32], sizes = [8, 32], strides = [1, 1]} : vector<8x96xf32> to vector<8x32xf32>
    %584 = arith.addf %582, %583 : vector<8x32xf32>
    %585 = arith.negf %584 : vector<8x32xf32>
    %586 = math.exp %585 : vector<8x32xf32>
    %cst_149 = arith.constant 1.000000e+00 : f32
    %587 = vector.broadcast %cst_149 : f32 to vector<8x32xf32>
    %588 = arith.addf %587, %586 : vector<8x32xf32>
    %589 = arith.divf %587, %588 : vector<8x32xf32>
    %590 = vector.extract_strided_slice %572 {offsets = [0, 64], sizes = [8, 32], strides = [1, 1]} : vector<8x96xf32> to vector<8x32xf32>
    %591 = vector.extract_strided_slice %573 {offsets = [0, 64], sizes = [8, 32], strides = [1, 1]} : vector<8x96xf32> to vector<8x32xf32>
    %592 = vector.broadcast %7 : vector<1x32xf32> to vector<8x32xf32>
    %593 = arith.addf %591, %592 : vector<8x32xf32>
    %594 = arith.mulf %581, %593 : vector<8x32xf32>
    %595 = arith.addf %590, %594 : vector<8x32xf32>
    %596 = math.tanh %595 : vector<8x32xf32>
    %597 = arith.subf %533, %596 : vector<8x32xf32>
    %598 = arith.mulf %589, %597 : vector<8x32xf32>
    %599 = arith.addf %596, %598 : vector<8x32xf32>
    %c8_i32 = arith.constant 8 : i32
    %600 = vector.broadcast %c8_i32 : i32 to vector<8x1xi32>
    %601 = arith.cmpi eq, %77, %600 : vector<8x1xi32>
    %602 = vector.shape_cast %601 : vector<8x1xi1> to vector<8x1xi1>
    %603 = vector.broadcast %602 : vector<8x1xi1> to vector<8x32xi1>
    %604 = arith.select %603, %599, %539 : vector<8x32xi1>, vector<8x32xf32>
    %c0_150 = arith.constant 0 : index
    %c0_151 = arith.constant 0 : index
    %605 = vector.load %arg11[%c0_150, %c0_151] : memref<32x5xf32, #tpu.memory_space<vmem>>, vector<32x5xf32>
    %cst_152 = arith.constant dense<0.000000e+00> : vector<8x5xf32>
    %606 = tpu.matmul %604, %605, %cst_152 {dimension_numbers = #tpu.dot_dimension_numbers<[1], [0], [0], [1], [0, 0, 1, 1], [], []>} : vector<8x32xf32>, vector<32x5xf32>, vector<8x5xf32> -> vector<8x5xf32>
    %c0_153 = arith.constant 0 : index
    %c0_154 = arith.constant 0 : index
    %607 = vector.load %arg12[%c0_153, %c0_154] : memref<1x5xf32, #tpu.memory_space<vmem>>, vector<1x5xf32>
    %608 = vector.broadcast %607 : vector<1x5xf32> to vector<8x5xf32>
    %609 = arith.addf %606, %608 : vector<8x5xf32>
    %cst_155 = arith.constant dense<0xFF800000> : vector<8xf32>
    %610 = vector.multi_reduction <maximumf>, %609, %cst_155 [1] : vector<8x5xf32> to vector<8xf32>
    %611 = vector.shape_cast %610 : vector<8xf32> to vector<8x1xf32>
    %612 = vector.broadcast %611 : vector<8x1xf32> to vector<8x5xf32>
    %613 = arith.subf %609, %612 : vector<8x5xf32>
    %614 = math.exp %613 : vector<8x5xf32>
    %cst_156 = arith.constant dense<0.000000e+00> : vector<8xf32>
    %615 = vector.multi_reduction <add>, %614, %cst_156 [1] : vector<8x5xf32> to vector<8xf32>
    %616 = vector.shape_cast %615 : vector<8xf32> to vector<8x1xf32>
    %617 = math.log %616 : vector<8x1xf32>
    %618 = vector.broadcast %617 : vector<8x1xf32> to vector<8x5xf32>
    %619 = arith.subf %613, %618 : vector<8x5xf32>
    %c0_157 = arith.constant 0 : index
    %c0_158 = arith.constant 0 : index
    %620 = vector.load %arg13[%c0_157, %c0_158] : memref<8x5xf32, #tpu.memory_space<vmem>>, vector<8x5xf32>
    tpu.vector_store %arg13[%c0_157, %c0_158], %619 {strides = array<i32>} : memref<8x5xf32, #tpu.memory_space<vmem>>, vector<8x5xf32>,
    return
  }
  func.func @transform_0(%arg0: i32) -> (i32, i32, i32) {
    %c0_i32 = arith.constant 0 : i32
    %c0_i32_0 = arith.constant 0 : i32
    %c0_i32_1 = arith.constant 0 : i32
    return %c0_i32, %arg0, %c0_i32_0 : i32, i32, i32
  }
  func.func @transform_1(%arg0: i32) -> (i32, i32) {
    %c0_i32 = arith.constant 0 : i32
    %c0_i32_0 = arith.constant 0 : i32
    return %arg0, %c0_i32 : i32, i32
  }
  func.func @transform_2(%arg0: i32) -> (i32, i32) {
    %c0_i32 = arith.constant 0 : i32
    %c0_i32_0 = arith.constant 0 : i32
    %c0_i32_1 = arith.constant 0 : i32
    return %c0_i32, %c0_i32_0 : i32, i32
  }
  func.func @transform_3(%arg0: i32) -> (i32, i32) {
    %c0_i32 = arith.constant 0 : i32
    %c0_i32_0 = arith.constant 0 : i32
    %c0_i32_1 = arith.constant 0 : i32
    return %c0_i32, %c0_i32_0 : i32, i32
  }
  func.func @transform_4(%arg0: i32) -> (i32, i32) {
    %c0_i32 = arith.constant 0 : i32
    %c0_i32_0 = arith.constant 0 : i32
    %c0_i32_1 = arith.constant 0 : i32
    return %c0_i32, %c0_i32_0 : i32, i32
  }
  func.func @transform_5(%arg0: i32) -> (i32, i32) {
    %c0_i32 = arith.constant 0 : i32
    %c0_i32_0 = arith.constant 0 : i32
    %c0_i32_1 = arith.constant 0 : i32
    return %c0_i32, %c0_i32_0 : i32, i32
  }
  func.func @transform_6(%arg0: i32) -> (i32, i32) {
    %c0_i32 = arith.constant 0 : i32
    %c0_i32_0 = arith.constant 0 : i32
    %c0_i32_1 = arith.constant 0 : i32
    return %c0_i32, %c0_i32_0 : i32, i32
  }
  func.func @transform_7(%arg0: i32) -> (i32, i32) {
    %c0_i32 = arith.constant 0 : i32
    %c0_i32_0 = arith.constant 0 : i32
    %c0_i32_1 = arith.constant 0 : i32
    return %c0_i32, %c0_i32_0 : i32, i32
  }
  func.func @transform_8(%arg0: i32) -> (i32, i32) {
    %c0_i32 = arith.constant 0 : i32
    %c0_i32_0 = arith.constant 0 : i32
    %c0_i32_1 = arith.constant 0 : i32
    return %c0_i32, %c0_i32_0 : i32, i32
  }
  func.func @transform_9(%arg0: i32) -> (i32, i32) {
    %c0_i32 = arith.constant 0 : i32
    %c0_i32_0 = arith.constant 0 : i32
    %c0_i32_1 = arith.constant 0 : i32
    return %c0_i32, %c0_i32_0 : i32, i32
  }
  func.func @transform_10(%arg0: i32) -> (i32, i32) {
    %c0_i32 = arith.constant 0 : i32
    %c0_i32_0 = arith.constant 0 : i32
    %c0_i32_1 = arith.constant 0 : i32
    return %c0_i32, %c0_i32_0 : i32, i32
  }
  func.func @transform_11(%arg0: i32) -> (i32, i32) {
    %c0_i32 = arith.constant 0 : i32
    %c0_i32_0 = arith.constant 0 : i32
    %c0_i32_1 = arith.constant 0 : i32
    return %c0_i32, %c0_i32_0 : i32, i32
  }
  func.func @transform_12(%arg0: i32) -> (i32, i32) {
    %c0_i32 = arith.constant 0 : i32
    %c0_i32_0 = arith.constant 0 : i32
    return %arg0, %c0_i32 : i32, i32
  }
}

</mosaic_0001>

<bundles_post_ra>
// kernel: rnn_classifier_forward.1
= control target key start
LH: loop header
LB: loop body
LE: loop exit
PB: predicated region body
PF: predicated region fallthrough
CT: control target
= control target key end

     0   :  { %v2756_v0 = vmov 0.0   ;;  %vm2757_vm0 = vmmov 0   ;;  %vm73_vm1 = vcmask 130048   ;;  %v2758_v4 = vmov 0   ;;  %s2759_s26 = smov 64   ;;  %s2761_s28 = smov 32   ;;  %s3374_s2 = inlined_call_operand.vmem [shape: bf16[16,96], index: 2, kind: input, shape index: {}]   ;;  %s3375_s0 = inlined_call_operand.vmem [shape: bf16[8,8,16], index: 0, kind: input, shape index: {}]   ;;  %s3376_s3 = inlined_call_operand.vmem [shape: bf16[32,96], index: 3, kind: input, shape index: {}]   ;;  %s3377_s5 = inlined_call_operand.vmem [shape: f32[1,32], index: 5, kind: input, shape index: {}]   ;;  %s3378_s4 = inlined_call_operand.vmem [shape: f32[1,96], index: 4, kind: input, shape index: {}]   ;;  %s3379_s7 = inlined_call_operand.vmem [shape: bf16[32,96], index: 7, kind: input, shape index: {}]   ;;  %s3380_s6 = inlined_call_operand.vmem [shape: bf16[32,96], index: 6, kind: input, shape index: {}]   ;;  %s3381_s9 = inlined_call_operand.vmem [shape: f32[1,32], index: 9, kind: input, shape index: {}]   ;;  %s3382_s8 = inlined_call_operand.vmem [shape: f32[1,96], index: 8, kind: input, shape index: {}]   ;;  %s3383_s1 = inlined_call_operand.vmem [shape: s32[8,1], index: 1, kind: input, shape index: {}]   ;;  %s3384_s10 = inlined_call_operand.vmem [shape: f32[32,5], index: 10, kind: input, shape index: {}]   ;;  %s3385_s11 = inlined_call_operand.vmem [shape: f32[1,5], index: 11, kind: input, shape index: {}]   ;;  %s3386_s12 = inlined_call_operand.vmem [shape: f32[8,5], index: 12, kind: output, shape index: {}]  }
   0x1   :  { %2383 = vmatprep.subr.bf16.mxu0 %v2756_v0  ;;  %v2831_v1 = vld [vmem:[%s3374_s2] sm:$0xff]   ;;  %2385 = vmatprep.mubr.msk.bf16.mxu0 %vm2757_vm0, %v2756_v0  ;;  %v2229_v5 = vld [vmem:[%s3375_s0 + $0x8] sm:$0xf]  ;;  %v2233_v6 = vld [vmem:[%s3375_s0 + $0x10] sm:$0xf]  ;;  %vm117_vm2 = vcmask 785408  }
   0x2   :  { %2389 = vmatprep.subr.bf16.mxu1 %v2756_v0  ;;  %2391 = vmatprep.mubr.msk.bf16.mxu1 %vm2757_vm0, %v2756_v0  ;;  %v60_v2 = vld [vmem:[%s3375_s0] sm:$0xf]  ;;  %v2237_v7 = vld [vmem:[%s3375_s0 + $0x18] sm:$0xf]  ;;  %v2878_v8 = vld [vmem:[%s3376_s3 + $0x8] sm:$0xff]   ;;  %vm462_vm3 = vcmask 261120  }
   0x3   :  { %2384 = vmatpush3.bf16.msra.mxu0 %v2831_v1  ;;  %2390 = vmatpush3.bf16.msra.mxu1 %v2831_v1  ;;  %v2244_v3 = vld [vmem:[%s3377_s5] ss:$0 sm:$0xff]  ;;  %v2227_v49 = vld [vmem:[%s3375_s0 + $0x4] sm:$0xf]  ;;  %v2920_v50 = vld [vmem:[%s3379_s7 + $0x8] sm:$0xff]  }
   0x4   :  { %2395 = vmatprep.subr.bf16.mxu0 %v2756_v0  ;;  %2401 = vmatprep.subr.bf16.mxu1 %v2756_v0  ;;  %v2885_v9 = vld [vmem:[%s3376_s3] sm:$0xff]   ;;  %v2231_v53 = vld [vmem:[%s3375_s0 + $0xc] sm:$0xf]  ;;  %v2235_v57 = vld [vmem:[%s3375_s0 + $0x14] sm:$0xf] }
   0x5   :  { %2640 = vset.pattern.permute.xlu0 %v2758_v4  ;;  %2641 = vset.pattern.permute.xlu1 %v2758_v4  ;;  %v2898_v10 = vld [vmem:[%s3378_s4] ss:$0 sm:$0xff]  ;;  %s2760_s4 = smov 96   ;;  %v2946_v55 = vld [vmem:[%s3380_s6 + $0x8] sm:$0xff]   ;;  %v2239_v59 = vld [vmem:[%s3375_s0 + $0x1c] sm:$0xf] }
   0x6   :  { %2386 = vmatmul.mubr.msk.bf16.vlgmr.msra.gmra.mxu0 %vm73_vm1, %v60_v2  ;;  %518 = vrot.lane.b32.xlu0 %v2244_v3, %s2759_s26  ;;  %v2930_v51 = vld [vmem:[%s3379_s7] sm:$0xff]  }
   0x7   :  { %2396 = vmatpush3.bf16.msra.mxu0 %v2831_v1  ;;  %2397 = vmatprep.mubr.msk.bf16.mxu0 %vm2757_vm0, %v2756_v0  ;;  %v2252_v56 = vld [vmem:[%s3381_s9] ss:$0 sm:$0xff] }
   0x8   :  { %2407 = vmatprep.subr.bf16.mxu0 %v2756_v0  ;;  %2392 = vmatmul.mubr.msk.bf16.vlgmr.msra.gmra.mxu1 %vm73_vm1, %v2227_v49  ;;  %v2965_v58 = vld [vmem:[%s3380_s6] sm:$0xff]  }
   0x9   :  { %2402 = vmatpush3.bf16.msra.mxu1 %v2831_v1  ;;  %2403 = vmatprep.mubr.msk.bf16.mxu1 %vm2757_vm0, %v2756_v0 }
   0xa   :  { %2413 = vmatprep.subr.bf16.mxu1 %v2756_v0 }
   0xe   :  { %2398 = vmatmul.mubr.msk.bf16.vlgmr.msra.gmra.mxu0 %vm73_vm1, %v2229_v5 }
   0xf   :  { %2408 = vmatpush3.bf16.msra.mxu0 %v2831_v1  ;;  %2409 = vmatprep.mubr.msk.bf16.mxu0 %vm2757_vm0, %v2756_v0 }
  0x10   :  { %2419 = vmatprep.subr.bf16.mxu0 %v2756_v0  ;;  %2404 = vmatmul.mubr.msk.bf16.vlgmr.msra.gmra.mxu1 %vm73_vm1, %v2231_v53 }
  0x11   :  { %2414 = vmatpush3.bf16.msra.mxu1 %v2831_v1  ;;  %2415 = vmatprep.mubr.msk.bf16.mxu1 %vm2757_vm0, %v2756_v0 }
  0x12   :  { %2425 = vmatprep.subr.bf16.mxu1 %v2756_v0 }
  0x16   :  { %2410 = vmatmul.mubr.msk.bf16.vlgmr.msra.gmra.mxu0 %vm73_vm1, %v2233_v6 }
  0x17   :  { %2420 = vmatpush3.bf16.msra.mxu0 %v2831_v1  ;;  %2421 = vmatprep.mubr.msk.bf16.mxu0 %vm2757_vm0, %v2756_v0 }
  0x18   :  { %2431 = vmatprep.subr.bf16.mxu0 %v2756_v0  ;;  %2416 = vmatmul.mubr.msk.bf16.vlgmr.msra.gmra.mxu1 %vm73_vm1, %v2235_v57 }
  0x19   :  { %2426 = vmatpush3.bf16.msra.mxu1 %v2831_v1  ;;  %2427 = vmatprep.mubr.msk.bf16.mxu1 %vm2757_vm0, %v2756_v0 }
  0x1a   :  { %2439 = vmatprep.subr.bf16.mxu1 %v2756_v0 }
  0x1e   :  { %2422 = vmatmul.mubr.msk.bf16.vlgmr.msra.gmra.mxu0 %vm73_vm1, %v2237_v7 }
  0x1f   :  { %2432 = vmatpush3.bf16.msra.mxu0 %v2878_v8  ;;  %2435 = vmatprep.mubr.msk.bf16.mxu0 %vm2757_vm0, %v2756_v0 }
  0x20   :  { %2433 = vmatprep.subr.bf16.mxu0 %v2756_v0  ;;  %2428 = vmatmul.mubr.msk.bf16.vlgmr.msra.gmra.mxu1 %vm73_vm1, %v2239_v59 }
  0x21   :  { %2440 = vmatpush3.bf16.msra.mxu1 %v2946_v55  ;;  %2443 = vmatprep.mubr.msk.bf16.mxu1 %vm2757_vm0, %v2756_v0 }
  0x22   :  { %2441 = vmatprep.subr.bf16.mxu1 %v2756_v0 }
  0x23   :  { %2434 = vmatpush3.bf16.msra.mxu0 %v2885_v9 }
  0x24   :  { %2447 = vmatprep.subr.bf16.mxu0 %v2756_v0 }
  0x25   :  { %2442 = vmatpush3.bf16.msra.mxu1 %v2965_v58 }
  0x26   :  { %2436 = vmatmul.mubr.bf16.vlgmr.msra.gmra.mxu0 %v2758_v4  ;;  %2455 = vmatprep.subr.bf16.mxu1 %v2756_v0 }
  0x27   :  { %2451 = vmatprep.mubr.msk.bf16.mxu0 %vm2757_vm0, %v2756_v0  ;;  %2448 = vmatpush3.bf16.msra.mxu0 %v2920_v50 }
  0x28   :  { %2449 = vmatprep.subr.bf16.mxu0 %v2756_v0 }
  0x2b   :  { %2450 = vmatpush3.bf16.msra.mxu0 %v2930_v51 }
  0x2c   :  { %2463 = vmatprep.subr.bf16.mxu0 %v2756_v0 }
  0x2e   :  { %2452 = vmatmul.mubr.bf16.vlgmr.msra.gmra.mxu0 %v2758_v4 }
  0x2f   :  { %2464 = vmatpush3.bf16.msra.mxu0 %v2946_v55  ;;  %2467 = vmatprep.mubr.msk.bf16.mxu0 %vm2757_vm0, %v2756_v0 }
  0x30   :  { %2465 = vmatprep.subr.bf16.mxu0 %v2756_v0 }
  0x33   :  { %2466 = vmatpush3.bf16.msra.mxu0 %v2965_v58 }
  0x34   :  { %2479 = vmatprep.subr.bf16.mxu0 %v2756_v0 }
  0x78   :  { %v2908_v31 = vpop.permute.xlu0 %518 }
  0xc6   :  { %v111_v11 = vpop.f32.mrf.mxu0 }
  0xc7   :  { %v112_v12 = vadd.f32 %v2898_v10, %v111_v11 }
  0xc8   :  { %v2387_v13 = vpop.f32.mrf.mxu0  ;;  %v158_v63 = vpop.f32.mrf.mxu1 }
  0xc9   :  { %118 = vst.msk [vmem:[#allocation2] sm:$0xff] %vm117_vm2, %v112_v12  ;;  %v159_v1 = vadd.f32 %v2898_v10, %v158_v63 }
  0xca   :  { %v114_v14 = vpop.f32.mrf.mxu0  ;;  %v2393_v2 = vpop.f32.mrf.mxu1 }
  0xcb   :  { %165 = vst.msk [vmem:[#allocation2 + $0x8] sm:$0xff] %vm117_vm2, %v159_v1 }
  0xcc   :  { %v2388_v15 = vpop.f32.mrf.mxu0  ;;  %v161_v3 = vpop.f32.mrf.mxu1 }
  0xce   :  { %v205_v16 = vpop.f32.mrf.mxu0  ;;  %v2394_v5 = vpop.f32.mrf.mxu1 }
  0xcf   :  { %v206_v17 = vadd.f32 %v2898_v10, %v205_v16 }
  0xd0   :  { %v2399_v18 = vpop.f32.mrf.mxu0  ;;  %v449_v37 = vld [vmem:[#allocation2] sm:$0xff]  ;;  %v252_v7 = vpop.f32.mrf.mxu1 }
  0xd1   :  { %212 = vst.msk [vmem:[#allocation2 + $0x10] sm:$0xff] %vm117_vm2, %v206_v17  ;;  %v253_v12 = vadd.f32 %v2898_v10, %v252_v7 }
  0xd2   :  { %v208_v19 = vpop.f32.mrf.mxu0  ;;  %v2405_v14 = vpop.f32.mrf.mxu1  ;;  %v707_v49 = vld [vmem:[#allocation2 + $0x8] sm:$0xff] }
  0xd3   :  { %259 = vst.msk [vmem:[#allocation2 + $0x18] sm:$0xff] %vm117_vm2, %v253_v12 }
  0xd4   :  { %v2400_v20 = vpop.f32.mrf.mxu0  ;;  %v255_v16 = vpop.f32.mrf.mxu1 }
  0xd6   :  { %v299_v21 = vpop.f32.mrf.mxu0  ;;  %v2406_v18 = vpop.f32.mrf.mxu1 }
  0xd7   :  { %v300_v22 = vadd.f32 %v2898_v10, %v299_v21 }
  0xd8   :  { %v2411_v23 = vpop.f32.mrf.mxu0  ;;  %v346_v20 = vpop.f32.mrf.mxu1 }
  0xd9   :  { %306 = vst.msk [vmem:[#allocation2 + $0x20] sm:$0xff] %vm117_vm2, %v300_v22  ;;  %v347_v21 = vadd.f32 %v2898_v10, %v346_v20 }
  0xda   :  { %v302_v24 = vpop.f32.mrf.mxu0  ;;  %v2417_v22 = vpop.f32.mrf.mxu1 }
  0xdb   :  { %353 = vst.msk [vmem:[#allocation2 + $0x28] sm:$0xff] %vm117_vm2, %v347_v21 }
  0xdc   :  { %v2412_v25 = vpop.f32.mrf.mxu0  ;;  %v349_v23 = vpop.f32.mrf.mxu1 }
  0xde   :  { %v393_v26 = vpop.f32.mrf.mxu0  ;;  %v2418_v24 = vpop.f32.mrf.mxu1 }
  0xdf   :  { %v394_v27 = vadd.f32 %v2898_v10, %v393_v26 }
  0xe0   :  { %v2423_v28 = vpop.f32.mrf.mxu0  ;;  %v440_v25 = vpop.f32.mrf.mxu1 }
  0xe1   :  { %400 = vst.msk [vmem:[#allocation2 + $0x30] sm:$0xff] %vm117_vm2, %v394_v27  ;;  %v441_v26 = vadd.f32 %v2898_v10, %v440_v25  ;;  %v3018_v10 = vld [vmem:[%s3382_s8] ss:$0 sm:$0xff] }
  0xe2   :  { %v396_v29 = vpop.f32.mrf.mxu0  ;;  %v2429_v27 = vpop.f32.mrf.mxu1 }
  0xe3   :  { %447 = vst.msk [vmem:[#allocation2 + $0x38] sm:$0xff] %vm117_vm2, %v441_v26 }
  0xe4   :  { %v2424_v30 = vpop.f32.mrf.mxu0  ;;  %v443_v28 = vpop.f32.mrf.mxu1 }
  0xe6   :  { %v500_v32 = vpop.f32.mrf.mxu0  ;;  %v2430_v29 = vpop.f32.mrf.mxu1 }
  0xe7   :  { %v521_v33 = vadd.f32 %v2908_v31, %v500_v32  ;;  %v506_v38 = vadd.f32 %v500_v32, %v449_v37 }
  0xe8   :  { %v2437_v34 = vpop.f32.mrf.mxu0 }
  0xe9   :  { %523 = vrot.lane.b32.xlu0 %v521_v33, %s2759_s26  ;;  %v2243_v39 = vmul.f32 -1.442695, %v506_v38 }
  0xea   :  { %v503_v35 = vpop.f32.mrf.mxu0 }
  0xeb   :  { %2649 = vpow2.f32 %v2243_v39 }
  0xec   :  { %v2438_v36 = vpop.f32.mrf.mxu0 }
  0xee   :  { %v655_v11 = vpop.f32.mrf.mxu0 }
  0xf0   :  { %v2453_v15 = vpop.f32.mrf.mxu0 }
  0xf2   :  { %v658_v17 = vpop.f32.mrf.mxu0 }
  0xf4   :  { %v2454_v19 = vpop.f32.mrf.mxu0 }
  0xf8   :  { %v2650_v40 = vpop.eup %2649 }
  0xf9   :  { %v510_v41 = vadd.f32 1.0, %v2650_v40 }
  0xfb   :  { %2651 = vrcp.f32 %v510_v41 }
 0x108   :  { %v2652_v42 = vpop.eup %2651 }
 0x15b   :  { %v524_v43 = vpop.permute.xlu0 %523 }
 0x15c   :  { %v526_v44 = vmul.f32 %v2652_v42, %v524_v43 }
 0x15e   :  { %528 = vrot.lane.b32.xlu1 %v526_v44, %s2759_s26 }
 0x1d0   :  { %v529_v45 = vpop.permute.xlu1 %528 }
 0x1d1   :  { %v531_v46 = vadd.f32 %v529_v45, %v449_v37 }
 0x1d3   :  { %2653 = vtanh.f32 %v531_v46 }
 0x1e0   :  { %v2654_v47 = vpop.eup %2653 }
 0x1e1   :  { %v533_v48 = vsub.f32 0.0, %v2654_v47 }
 0x1e3   :  { %535 = vrot.lane.b32.xlu1 %v533_v48, %s2760_s4 }
 0x255   :  { %v536_v52 = vpop.permute.xlu1 %535 }
 0x256   :  { %v538_v54 = vmul.f32 %v2652_v42, %v536_v52 }
 0x258   :  { %540 = vrot.lane.b32.xlu0 %v538_v54, %s2761_s28 }
 0x25c   :  { %673 = vrot.lane.b32.xlu0 %v2252_v56, %s2759_s26 }
 0x2ca   :  { %v541_v60 = vpop.permute.xlu0 %540 }
 0x2cb   :  { %v2984_v61 = vadd.f32 %v2654_v47, %v541_v60 }
 0x2cd   :  { %v544_v62 = vpack.c.bf16 %v2984_v61, %v2984_v61 }
 0x2ce   :  { %v2991_v6 = vpop.permute.xlu0 %673 }
 0x2cf   :  { %552 = vrot.lane.b32.xlu1 %v544_v62, %s2759_s26  ;;  %v676_v13 = vadd.f32 %v2991_v6, %v655_v11 }
 0x2d1   :  { %678 = vrot.lane.b32.xlu0 %v676_v13, %s2759_s26 }
 0x341   :  { %v553_v30 = vpop.permute.xlu1 %552 }
 0x342   :  { %2444 = vmatmul.mubr.msk.bf16.vlgmr.msra.gmra.mxu1 %vm462_vm3, %v553_v30 }
 0x343   :  { %2456 = vmatpush3.bf16.msra.mxu1 %v2878_v8  ;;  %2459 = vmatprep.mubr.msk.bf16.mxu1 %vm2757_vm0, %v2756_v0  ;;  %v679_v46 = vpop.permute.xlu0 %678 }
 0x344   :  { %2457 = vmatprep.subr.bf16.mxu1 %v2756_v0 }
 0x347   :  { %2458 = vmatpush3.bf16.msra.mxu1 %v2885_v9 }
 0x348   :  { %2471 = vmatprep.subr.bf16.mxu1 %v2756_v0 }
 0x34a   :  { %2460 = vmatmul.mubr.msk.bf16.vlgmr.msra.gmra.mxu1 %vm462_vm3, %v553_v30 }
 0x34b   :  { %2472 = vmatpush3.bf16.msra.mxu1 %v2920_v50  ;;  %2475 = vmatprep.mubr.msk.bf16.mxu1 %vm2757_vm0, %v2756_v0 }
 0x34c   :  { %2473 = vmatprep.subr.bf16.mxu1 %v2756_v0 }
 0x34f   :  { %2474 = vmatpush3.bf16.msra.mxu1 %v2930_v51 }
 0x350   :  { %2487 = vmatprep.subr.bf16.mxu1 %v2756_v0 }
 0x402   :  { %v603_v32 = vpop.f32.mrf.mxu1 }
 0x403   :  { %v604_v33 = vadd.f32 %v3018_v10, %v603_v32 }
 0x404   :  { %v2445_v34 = vpop.f32.mrf.mxu1 }
 0x405   :  { %v661_v35 = vadd.f32 %v655_v11, %v604_v33 }
 0x406   :  { %v606_v36 = vpop.f32.mrf.mxu1 }
 0x407   :  { %v2251_v37 = vmul.f32 -1.442695, %v661_v35 }
 0x408   :  { %v2446_v38 = vpop.f32.mrf.mxu1 }
 0x409   :  { %2655 = vpow2.f32 %v2251_v37 }
 0x40a   :  { %v742_v39 = vpop.f32.mrf.mxu1 }
 0x40b   :  { %v755_v40 = vadd.f32 %v742_v39, %v2908_v31  ;;  %v748_v52 = vadd.f32 %v742_v39, %v707_v49 }
 0x40c   :  { %v2461_v41 = vpop.f32.mrf.mxu1 }
 0x40d   :  { %757 = vrot.lane.b32.xlu1 %v755_v40, %s2759_s26  ;;  %v2254_v53 = vmul.f32 -1.442695, %v748_v52 }
 0x40e   :  { %v745_v42 = vpop.f32.mrf.mxu1 }
 0x410   :  { %v2462_v43 = vpop.f32.mrf.mxu1 }
 0x416   :  { %v2656_v44 = vpop.eup %2655 }
 0x417   :  { %v665_v45 = vadd.f32 1.0, %v2656_v44 }
 0x419   :  { %2657 = vrcp.f32 %v665_v45 }
 0x41a   :  { %2659 = vpow2.f32 %v2254_v53 }
 0x426   :  { %v2658_v47 = vpop.eup %2657 }
 0x427   :  { %v681_v48 = vmul.f32 %v2658_v47, %v679_v46  ;;  %v2660_v54 = vpop.eup %2659  ;;  %v909_v46 = vld [vmem:[#allocation2 + $0x10] sm:$0xff] }
 0x428   :  { %v752_v56 = vadd.f32 1.0, %v2660_v54 }
 0x429   :  { %683 = vrot.lane.b32.xlu0 %v681_v48, %s2759_s26 }
 0x42a   :  { %2661 = vrcp.f32 %v752_v56 }
 0x437   :  { %v2662_v57 = vpop.eup %2661 }
 0x47f   :  { %v758_v59 = vpop.permute.xlu1 %757 }
 0x480   :  { %v760_v60 = vmul.f32 %v2662_v57, %v758_v59 }
 0x482   :  { %762 = vrot.lane.b32.xlu1 %v760_v60, %s2759_s26 }
 0x49b   :  { %v684_v62 = vpop.permute.xlu0 %683 }
 0x49c   :  { %v686_v63 = vadd.f32 %v684_v62, %v604_v33 }
 0x49e   :  { %2663 = vtanh.f32 %v686_v63 }
 0x4ab   :  { %v2664_v1 = vpop.eup %2663 }
 0x4ac   :  { %v688_v2 = vsub.f32 0.0, %v2664_v1 }
 0x4ae   :  { %690 = vrot.lane.b32.xlu0 %v688_v2, %s2760_s4 }
 0x4f4   :  { %v763_v3 = vpop.permute.xlu1 %762 }
 0x4f5   :  { %v765_v5 = vadd.f32 %v763_v3, %v707_v49 }
 0x4f7   :  { %2665 = vtanh.f32 %v765_v5 }
 0x504   :  { %v2666_v7 = vpop.eup %2665 }
 0x505   :  { %v767_v11 = vsub.f32 %v2984_v61, %v2666_v7 }
 0x507   :  { %769 = vrot.lane.b32.xlu1 %v767_v11, %s2760_s4 }
 0x520   :  { %v691_v12 = vpop.permute.xlu0 %690 }
 0x521   :  { %v693_v13 = vmul.f32 %v2658_v47, %v691_v12 }
 0x523   :  { %695 = vrot.lane.b32.xlu0 %v693_v13, %s2761_s28 }
 0x579   :  { %v770_v14 = vpop.permute.xlu1 %769 }
 0x57a   :  { %v772_v15 = vmul.f32 %v2662_v57, %v770_v14 }
 0x57c   :  { %774 = vrot.lane.b32.xlu1 %v772_v15, %s2761_s28 }
 0x595   :  { %v696_v16 = vpop.permute.xlu0 %695 }
 0x596   :  { %v3030_v17 = vadd.f32 %v2664_v1, %v696_v16 }
 0x598   :  { %v699_v18 = vpack.c.bf16 %v3030_v17, %v3030_v17 }
 0x59a   :  { %826 = vrot.lane.b32.xlu0 %v699_v18, %s2759_s26 }
 0x5ee   :  { %v775_v19 = vpop.permute.xlu1 %774 }
 0x5ef   :  { %v3035_v61 = vadd.f32 %v2666_v7, %v775_v19 }
 0x5f1   :  { %v778_v20 = vpack.c.bf16 %v3035_v61, %v3035_v61 }
 0x5f3   :  { %780 = vrot.lane.b32.xlu1 %v778_v20, %s2759_s26 }
 0x60c   :  { %v827_v21 = vpop.permute.xlu0 %826 }
 0x60d   :  { %2476 = vmatmul.mubr.msk.bf16.vlgmr.msra.gmra.mxu1 %vm462_vm3, %v827_v21 }
 0x60e   :  { %2488 = vmatpush3.bf16.msra.mxu1 %v2946_v55  ;;  %2491 = vmatprep.mubr.msk.bf16.mxu1 %vm2757_vm0, %v2756_v0 }
 0x60f   :  { %2489 = vmatprep.subr.bf16.mxu1 %v2756_v0 }
 0x612   :  { %2490 = vmatpush3.bf16.msra.mxu1 %v2965_v58 }
 0x613   :  { %2503 = vmatprep.subr.bf16.mxu1 %v2756_v0 }
 0x665   :  { %v781_v22 = vpop.permute.xlu1 %780 }
 0x666   :  { %2468 = vmatmul.mubr.msk.bf16.vlgmr.msra.gmra.mxu0 %vm462_vm3, %v781_v22 }
 0x667   :  { %2480 = vmatpush3.bf16.msra.mxu0 %v2878_v8  ;;  %2483 = vmatprep.mubr.msk.bf16.mxu0 %vm2757_vm0, %v2756_v0 }
 0x668   :  { %2481 = vmatprep.subr.bf16.mxu0 %v2756_v0 }
 0x66b   :  { %2482 = vmatpush3.bf16.msra.mxu0 %v2885_v9 }
 0x66c   :  { %2495 = vmatprep.subr.bf16.mxu0 %v2756_v0 }
 0x66e   :  { %2484 = vmatmul.mubr.msk.bf16.vlgmr.msra.gmra.mxu0 %vm462_vm3, %v781_v22 }
 0x66f   :  { %2496 = vmatpush3.bf16.msra.mxu0 %v2920_v50  ;;  %2499 = vmatprep.mubr.msk.bf16.mxu0 %vm2757_vm0, %v2756_v0 }
 0x670   :  { %2497 = vmatprep.subr.bf16.mxu0 %v2756_v0 }
 0x673   :  { %2498 = vmatpush3.bf16.msra.mxu0 %v2930_v51 }
 0x674   :  { %2511 = vmatprep.subr.bf16.mxu0 %v2756_v0 }
 0x6cd   :  { %v865_v23 = vpop.f32.mrf.mxu1 }
 0x6ce   :  { %v878_v24 = vadd.f32 %v865_v23, %v2991_v6 }
 0x6cf   :  { %v2477_v25 = vpop.f32.mrf.mxu1 }
 0x6d0   :  { %880 = vrot.lane.b32.xlu0 %v878_v24, %s2759_s26 }
 0x6d1   :  { %v868_v26 = vpop.f32.mrf.mxu1 }
 0x6d3   :  { %v2478_v27 = vpop.f32.mrf.mxu1 }
 0x726   :  { %v819_v28 = vpop.f32.mrf.mxu0 }
 0x727   :  { %v820_v29 = vadd.f32 %v3018_v10, %v819_v28 }
 0x728   :  { %v2469_v30 = vpop.f32.mrf.mxu0 }
 0x729   :  { %v871_v32 = vadd.f32 %v865_v23, %v820_v29 }
 0x72a   :  { %v822_v33 = vpop.f32.mrf.mxu0 }
 0x72b   :  { %v2257_v34 = vmul.f32 -1.442695, %v871_v32 }
 0x72c   :  { %v2470_v35 = vpop.f32.mrf.mxu0 }
 0x72d   :  { %2667 = vpow2.f32 %v2257_v34 }
 0x72e   :  { %v944_v36 = vpop.f32.mrf.mxu0 }
 0x72f   :  { %v957_v37 = vadd.f32 %v944_v36, %v2908_v31  ;;  %v950_v47 = vadd.f32 %v944_v36, %v909_v46 }
 0x730   :  { %v2485_v38 = vpop.f32.mrf.mxu0 }
 0x731   :  { %959 = vrot.lane.b32.xlu1 %v957_v37, %s2759_s26  ;;  %v2259_v48 = vmul.f32 -1.442695, %v950_v47 }
 0x732   :  { %v947_v39 = vpop.f32.mrf.mxu0 }
 0x734   :  { %v2486_v40 = vpop.f32.mrf.mxu0 }
 0x73a   :  { %v2668_v41 = vpop.eup %2667 }
 0x73b   :  { %v875_v42 = vadd.f32 1.0, %v2668_v41 }
 0x73d   :  { %2669 = vrcp.f32 %v875_v42 }
 0x73e   :  { %2671 = vpow2.f32 %v2259_v48 }
 0x742   :  { %v881_v44 = vpop.permute.xlu0 %880 }
 0x74a   :  { %v2670_v43 = vpop.eup %2669 }
 0x74b   :  { %v883_v45 = vmul.f32 %v2670_v43, %v881_v44  ;;  %v2672_v49 = vpop.eup %2671  ;;  %v1111_v44 = vld [vmem:[#allocation2 + $0x18] sm:$0xff] }
 0x74c   :  { %v954_v52 = vadd.f32 1.0, %v2672_v49 }
 0x74d   :  { %885 = vrot.lane.b32.xlu0 %v883_v45, %s2759_s26 }
 0x74e   :  { %2673 = vrcp.f32 %v954_v52 }
 0x75b   :  { %v2674_v53 = vpop.eup %2673 }
 0x7a3   :  { %v960_v54 = vpop.permute.xlu1 %959 }
 0x7a4   :  { %v962_v56 = vmul.f32 %v2674_v53, %v960_v54 }
 0x7a6   :  { %964 = vrot.lane.b32.xlu1 %v962_v56, %s2759_s26 }
 0x7bf   :  { %v886_v57 = vpop.permute.xlu0 %885 }
 0x7c0   :  { %v888_v59 = vadd.f32 %v886_v57, %v820_v29 }
 0x7c2   :  { %2675 = vtanh.f32 %v888_v59 }
 0x7cf   :  { %v2676_v60 = vpop.eup %2675 }
 0x7d0   :  { %v890_v62 = vsub.f32 %v3030_v17, %v2676_v60 }
 0x7d2   :  { %892 = vrot.lane.b32.xlu0 %v890_v62, %s2760_s4 }
 0x818   :  { %v965_v63 = vpop.permute.xlu1 %964 }
 0x819   :  { %v967_v1 = vadd.f32 %v965_v63, %v909_v46 }
 0x81b   :  { %2677 = vtanh.f32 %v967_v1 }
 0x828   :  { %v2678_v2 = vpop.eup %2677 }
 0x829   :  { %v969_v3 = vsub.f32 %v3035_v61, %v2678_v2 }
 0x82b   :  { %971 = vrot.lane.b32.xlu1 %v969_v3, %s2760_s4 }
 0x844   :  { %v893_v5 = vpop.permute.xlu0 %892 }
 0x845   :  { %v895_v7 = vmul.f32 %v2670_v43, %v893_v5 }
 0x847   :  { %897 = vrot.lane.b32.xlu0 %v895_v7, %s2761_s28 }
 0x89d   :  { %v972_v11 = vpop.permute.xlu1 %971 }
 0x89e   :  { %v974_v12 = vmul.f32 %v2674_v53, %v972_v11 }
 0x8a0   :  { %976 = vrot.lane.b32.xlu1 %v974_v12, %s2761_s28 }
 0x8b9   :  { %v898_v13 = vpop.permute.xlu0 %897 }
 0x8ba   :  { %v3074_v14 = vadd.f32 %v2676_v60, %v898_v13 }
 0x8bc   :  { %v901_v15 = vpack.c.bf16 %v3074_v14, %v3074_v14 }
 0x8be   :  { %1028 = vrot.lane.b32.xlu0 %v901_v15, %s2759_s26 }
 0x912   :  { %v977_v16 = vpop.permute.xlu1 %976 }
 0x913   :  { %v3079_v18 = vadd.f32 %v2678_v2, %v977_v16 }
 0x915   :  { %v980_v19 = vpack.c.bf16 %v3079_v18, %v3079_v18 }
 0x917   :  { %982 = vrot.lane.b32.xlu1 %v980_v19, %s2759_s26 }
 0x930   :  { %v1029_v61 = vpop.permute.xlu0 %1028 }
 0x931   :  { %2500 = vmatmul.mubr.msk.bf16.vlgmr.msra.gmra.mxu0 %vm462_vm3, %v1029_v61 }
 0x932   :  { %2512 = vmatpush3.bf16.msra.mxu0 %v2946_v55  ;;  %2515 = vmatprep.mubr.msk.bf16.mxu0 %vm2757_vm0, %v2756_v0 }
 0x933   :  { %2513 = vmatprep.subr.bf16.mxu0 %v2756_v0 }
 0x936   :  { %2514 = vmatpush3.bf16.msra.mxu0 %v2965_v58 }
 0x937   :  { %2527 = vmatprep.subr.bf16.mxu0 %v2756_v0 }
 0x989   :  { %v983_v20 = vpop.permute.xlu1 %982 }
 0x98a   :  { %2492 = vmatmul.mubr.msk.bf16.vlgmr.msra.gmra.mxu1 %vm462_vm3, %v983_v20 }
 0x98b   :  { %2504 = vmatpush3.bf16.msra.mxu1 %v2878_v8  ;;  %2507 = vmatprep.mubr.msk.bf16.mxu1 %vm2757_vm0, %v2756_v0 }
 0x98c   :  { %2505 = vmatprep.subr.bf16.mxu1 %v2756_v0 }
 0x98f   :  { %2506 = vmatpush3.bf16.msra.mxu1 %v2885_v9 }
 0x990   :  { %2519 = vmatprep.subr.bf16.mxu1 %v2756_v0 }
 0x992   :  { %2508 = vmatmul.mubr.msk.bf16.vlgmr.msra.gmra.mxu1 %vm462_vm3, %v983_v20 }
 0x993   :  { %2520 = vmatpush3.bf16.msra.mxu1 %v2920_v50  ;;  %2523 = vmatprep.mubr.msk.bf16.mxu1 %vm2757_vm0, %v2756_v0 }
 0x994   :  { %2521 = vmatprep.subr.bf16.mxu1 %v2756_v0 }
 0x997   :  { %2522 = vmatpush3.bf16.msra.mxu1 %v2930_v51 }
 0x998   :  { %2535 = vmatprep.subr.bf16.mxu1 %v2756_v0 }
 0x9f1   :  { %v1067_v21 = vpop.f32.mrf.mxu0 }
 0x9f2   :  { %v1080_v22 = vadd.f32 %v1067_v21, %v2991_v6 }
 0x9f3   :  { %v2501_v23 = vpop.f32.mrf.mxu0 }
 0x9f4   :  { %1082 = vrot.lane.b32.xlu0 %v1080_v22, %s2759_s26 }
 0x9f5   :  { %v1070_v24 = vpop.f32.mrf.mxu0 }
 0x9f7   :  { %v2502_v25 = vpop.f32.mrf.mxu0 }
 0xa4a   :  { %v1021_v26 = vpop.f32.mrf.mxu1 }
 0xa4b   :  { %v1022_v27 = vadd.f32 %v3018_v10, %v1021_v26 }
 0xa4c   :  { %v2493_v28 = vpop.f32.mrf.mxu1 }
 0xa4d   :  { %v1073_v29 = vadd.f32 %v1067_v21, %v1022_v27 }
 0xa4e   :  { %v1024_v30 = vpop.f32.mrf.mxu1 }
 0xa4f   :  { %v2262_v32 = vmul.f32 -1.442695, %v1073_v29 }
 0xa50   :  { %v2494_v33 = vpop.f32.mrf.mxu1 }
 0xa51   :  { %2679 = vpow2.f32 %v2262_v32 }
 0xa52   :  { %v1146_v34 = vpop.f32.mrf.mxu1 }
 0xa53   :  { %v1159_v35 = vadd.f32 %v1146_v34, %v2908_v31  ;;  %v1152_v45 = vadd.f32 %v1146_v34, %v1111_v44 }
 0xa54   :  { %v2509_v36 = vpop.f32.mrf.mxu1 }
 0xa55   :  { %1161 = vrot.lane.b32.xlu1 %v1159_v35, %s2759_s26  ;;  %v2264_v46 = vmul.f32 -1.442695, %v1152_v45 }
 0xa56   :  { %v1149_v37 = vpop.f32.mrf.mxu1 }
 0xa58   :  { %v2510_v38 = vpop.f32.mrf.mxu1 }
 0xa5e   :  { %v2680_v39 = vpop.eup %2679 }
 0xa5f   :  { %v1077_v40 = vadd.f32 1.0, %v2680_v39 }
 0xa61   :  { %2681 = vrcp.f32 %v1077_v40 }
 0xa62   :  { %2683 = vpow2.f32 %v2264_v46 }
 0xa66   :  { %v1083_v42 = vpop.permute.xlu0 %1082 }
 0xa6e   :  { %v2682_v41 = vpop.eup %2681 }
 0xa6f   :  { %v1085_v43 = vmul.f32 %v2682_v41, %v1083_v42  ;;  %v2684_v47 = vpop.eup %2683 }
 0xa70   :  { %v1156_v48 = vadd.f32 1.0, %v2684_v47 }
 0xa71   :  { %1087 = vrot.lane.b32.xlu0 %v1085_v43, %s2759_s26  ;;  %v1313_v43 = vld [vmem:[#allocation2 + $0x20] sm:$0xff] }
 0xa72   :  { %2685 = vrcp.f32 %v1156_v48 }
 0xa7f   :  { %v2686_v49 = vpop.eup %2685 }
 0xac7   :  { %v1162_v52 = vpop.permute.xlu1 %1161 }
 0xac8   :  { %v1164_v53 = vmul.f32 %v2686_v49, %v1162_v52 }
 0xaca   :  { %1166 = vrot.lane.b32.xlu1 %v1164_v53, %s2759_s26 }
 0xae3   :  { %v1088_v54 = vpop.permute.xlu0 %1087 }
 0xae4   :  { %v1090_v56 = vadd.f32 %v1088_v54, %v1022_v27 }
 0xae6   :  { %2687 = vtanh.f32 %v1090_v56 }
 0xaf3   :  { %v2688_v57 = vpop.eup %2687 }
 0xaf4   :  { %v1092_v59 = vsub.f32 %v3074_v14, %v2688_v57 }
 0xaf6   :  { %1094 = vrot.lane.b32.xlu0 %v1092_v59, %s2760_s4 }
 0xb3c   :  { %v1167_v60 = vpop.permute.xlu1 %1166 }
 0xb3d   :  { %v1169_v62 = vadd.f32 %v1167_v60, %v1111_v44 }
 0xb3f   :  { %2689 = vtanh.f32 %v1169_v62 }
 0xb4c   :  { %v2690_v63 = vpop.eup %2689 }
 0xb4d   :  { %v1171_v1 = vsub.f32 %v3079_v18, %v2690_v63 }
 0xb4f   :  { %1173 = vrot.lane.b32.xlu1 %v1171_v1, %s2760_s4 }
 0xb68   :  { %v1095_v2 = vpop.permute.xlu0 %1094 }
 0xb69   :  { %v1097_v3 = vmul.f32 %v2682_v41, %v1095_v2 }
 0xb6b   :  { %1099 = vrot.lane.b32.xlu0 %v1097_v3, %s2761_s28 }
 0xbc1   :  { %v1174_v5 = vpop.permute.xlu1 %1173 }
 0xbc2   :  { %v1176_v7 = vmul.f32 %v2686_v49, %v1174_v5 }
 0xbc4   :  { %1178 = vrot.lane.b32.xlu1 %v1176_v7, %s2761_s28 }
 0xbdd   :  { %v1100_v11 = vpop.permute.xlu0 %1099 }
 0xbde   :  { %v3118_v12 = vadd.f32 %v2688_v57, %v1100_v11 }
 0xbe0   :  { %v1103_v13 = vpack.c.bf16 %v3118_v12, %v3118_v12 }
 0xbe2   :  { %1230 = vrot.lane.b32.xlu0 %v1103_v13, %s2759_s26 }
 0xc36   :  { %v1179_v15 = vpop.permute.xlu1 %1178 }
 0xc37   :  { %v3123_v16 = vadd.f32 %v2690_v63, %v1179_v15 }
 0xc39   :  { %v1182_v18 = vpack.c.bf16 %v3123_v16, %v3123_v16 }
 0xc3b   :  { %1184 = vrot.lane.b32.xlu1 %v1182_v18, %s2759_s26 }
 0xc54   :  { %v1231_v19 = vpop.permute.xlu0 %1230 }
 0xc55   :  { %2524 = vmatmul.mubr.msk.bf16.vlgmr.msra.gmra.mxu1 %vm462_vm3, %v1231_v19 }
 0xc56   :  { %2536 = vmatpush3.bf16.msra.mxu1 %v2946_v55  ;;  %2539 = vmatprep.mubr.msk.bf16.mxu1 %vm2757_vm0, %v2756_v0 }
 0xc57   :  { %2537 = vmatprep.subr.bf16.mxu1 %v2756_v0 }
 0xc5a   :  { %2538 = vmatpush3.bf16.msra.mxu1 %v2965_v58 }
 0xc5b   :  { %2551 = vmatprep.subr.bf16.mxu1 %v2756_v0 }
 0xcad   :  { %v1185_v61 = vpop.permute.xlu1 %1184 }
 0xcae   :  { %2516 = vmatmul.mubr.msk.bf16.vlgmr.msra.gmra.mxu0 %vm462_vm3, %v1185_v61 }
 0xcaf   :  { %2528 = vmatpush3.bf16.msra.mxu0 %v2878_v8  ;;  %2531 = vmatprep.mubr.msk.bf16.mxu0 %vm2757_vm0, %v2756_v0 }
 0xcb0   :  { %2529 = vmatprep.subr.bf16.mxu0 %v2756_v0 }
 0xcb3   :  { %2530 = vmatpush3.bf16.msra.mxu0 %v2885_v9 }
 0xcb4   :  { %2543 = vmatprep.subr.bf16.mxu0 %v2756_v0 }
 0xcb6   :  { %2532 = vmatmul.mubr.msk.bf16.vlgmr.msra.gmra.mxu0 %vm462_vm3, %v1185_v61 }
 0xcb7   :  { %2544 = vmatpush3.bf16.msra.mxu0 %v2920_v50  ;;  %2547 = vmatprep.mubr.msk.bf16.mxu0 %vm2757_vm0, %v2756_v0 }
 0xcb8   :  { %2545 = vmatprep.subr.bf16.mxu0 %v2756_v0 }
 0xcbb   :  { %2546 = vmatpush3.bf16.msra.mxu0 %v2930_v51 }
 0xcbc   :  { %2559 = vmatprep.subr.bf16.mxu0 %v2756_v0 }
 0xd15   :  { %v1269_v20 = vpop.f32.mrf.mxu1 }
 0xd16   :  { %v1282_v21 = vadd.f32 %v1269_v20, %v2991_v6 }
 0xd17   :  { %v2525_v22 = vpop.f32.mrf.mxu1 }
 0xd18   :  { %1284 = vrot.lane.b32.xlu1 %v1282_v21, %s2759_s26 }
 0xd19   :  { %v1272_v23 = vpop.f32.mrf.mxu1 }
 0xd1b   :  { %v2526_v24 = vpop.f32.mrf.mxu1 }
 0xd6e   :  { %v1223_v25 = vpop.f32.mrf.mxu0 }
 0xd6f   :  { %v1224_v26 = vadd.f32 %v3018_v10, %v1223_v25 }
 0xd70   :  { %v2517_v27 = vpop.f32.mrf.mxu0 }
 0xd71   :  { %v1275_v28 = vadd.f32 %v1269_v20, %v1224_v26 }
 0xd72   :  { %v1226_v29 = vpop.f32.mrf.mxu0 }
 0xd73   :  { %v2267_v30 = vmul.f32 -1.442695, %v1275_v28 }
 0xd74   :  { %v2518_v32 = vpop.f32.mrf.mxu0 }
 0xd75   :  { %2691 = vpow2.f32 %v2267_v30 }
 0xd76   :  { %v1348_v33 = vpop.f32.mrf.mxu0 }
 0xd77   :  { %v1361_v34 = vadd.f32 %v1348_v33, %v2908_v31  ;;  %v1354_v44 = vadd.f32 %v1348_v33, %v1313_v43 }
 0xd78   :  { %v2533_v35 = vpop.f32.mrf.mxu0 }
 0xd79   :  { %1363 = vrot.lane.b32.xlu0 %v1361_v34, %s2759_s26  ;;  %v2269_v45 = vmul.f32 -1.442695, %v1354_v44 }
 0xd7a   :  { %v1351_v36 = vpop.f32.mrf.mxu0 }
 0xd7c   :  { %v2534_v37 = vpop.f32.mrf.mxu0 }
 0xd82   :  { %v2692_v38 = vpop.eup %2691 }
 0xd83   :  { %v1279_v39 = vadd.f32 1.0, %v2692_v38 }
 0xd85   :  { %2693 = vrcp.f32 %v1279_v39 }
 0xd86   :  { %2695 = vpow2.f32 %v2269_v45 }
 0xd8a   :  { %v1285_v41 = vpop.permute.xlu1 %1284 }
 0xd92   :  { %v2694_v40 = vpop.eup %2693 }
 0xd93   :  { %v1287_v42 = vmul.f32 %v2694_v40, %v1285_v41  ;;  %v2696_v46 = vpop.eup %2695  ;;  %v1515_v41 = vld [vmem:[#allocation2 + $0x28] sm:$0xff] }
 0xd94   :  { %v1358_v47 = vadd.f32 1.0, %v2696_v46 }
 0xd95   :  { %1289 = vrot.lane.b32.xlu1 %v1287_v42, %s2759_s26 }
 0xd96   :  { %2697 = vrcp.f32 %v1358_v47 }
 0xda3   :  { %v2698_v48 = vpop.eup %2697 }
 0xdeb   :  { %v1364_v49 = vpop.permute.xlu0 %1363 }
 0xdec   :  { %v1366_v52 = vmul.f32 %v2698_v48, %v1364_v49 }
 0xdee   :  { %1368 = vrot.lane.b32.xlu0 %v1366_v52, %s2759_s26 }
 0xe07   :  { %v1290_v53 = vpop.permute.xlu1 %1289 }
 0xe08   :  { %v1292_v54 = vadd.f32 %v1290_v53, %v1224_v26 }
 0xe0a   :  { %2699 = vtanh.f32 %v1292_v54 }
 0xe17   :  { %v2700_v56 = vpop.eup %2699 }
 0xe18   :  { %v1294_v57 = vsub.f32 %v3118_v12, %v2700_v56 }
 0xe1a   :  { %1296 = vrot.lane.b32.xlu1 %v1294_v57, %s2760_s4 }
 0xe60   :  { %v1369_v59 = vpop.permute.xlu0 %1368 }
 0xe61   :  { %v1371_v60 = vadd.f32 %v1369_v59, %v1313_v43 }
 0xe63   :  { %2701 = vtanh.f32 %v1371_v60 }
 0xe70   :  { %v2702_v62 = vpop.eup %2701 }
 0xe71   :  { %v1373_v63 = vsub.f32 %v3123_v16, %v2702_v62 }
 0xe73   :  { %1375 = vrot.lane.b32.xlu0 %v1373_v63, %s2760_s4 }
 0xe8c   :  { %v1297_v1 = vpop.permute.xlu1 %1296 }
 0xe8d   :  { %v1299_v2 = vmul.f32 %v2694_v40, %v1297_v1 }
 0xe8f   :  { %1301 = vrot.lane.b32.xlu1 %v1299_v2, %s2761_s28 }
 0xee5   :  { %v1376_v3 = vpop.permute.xlu0 %1375 }
 0xee6   :  { %v1378_v5 = vmul.f32 %v2698_v48, %v1376_v3 }
 0xee8   :  { %1380 = vrot.lane.b32.xlu0 %v1378_v5, %s2761_s28 }
 0xf01   :  { %v1302_v7 = vpop.permute.xlu1 %1301 }
 0xf02   :  { %v3162_v11 = vadd.f32 %v2700_v56, %v1302_v7 }
 0xf04   :  { %v1305_v13 = vpack.c.bf16 %v3162_v11, %v3162_v11 }
 0xf06   :  { %1432 = vrot.lane.b32.xlu0 %v1305_v13, %s2759_s26 }
 0xf5a   :  { %v1381_v15 = vpop.permute.xlu0 %1380 }
 0xf5b   :  { %v3167_v16 = vadd.f32 %v2702_v62, %v1381_v15 }
 0xf5d   :  { %v1384_v18 = vpack.c.bf16 %v3167_v16, %v3167_v16 }
 0xf5f   :  { %1386 = vrot.lane.b32.xlu1 %v1384_v18, %s2759_s26 }
 0xf78   :  { %v1433_v19 = vpop.permute.xlu0 %1432 }
 0xf79   :  { %2548 = vmatmul.mubr.msk.bf16.vlgmr.msra.gmra.mxu0 %vm462_vm3, %v1433_v19 }
 0xf7a   :  { %2560 = vmatpush3.bf16.msra.mxu0 %v2946_v55  ;;  %2563 = vmatprep.mubr.msk.bf16.mxu0 %vm2757_vm0, %v2756_v0 }
 0xf7b   :  { %2561 = vmatprep.subr.bf16.mxu0 %v2756_v0 }
 0xf7e   :  { %2562 = vmatpush3.bf16.msra.mxu0 %v2965_v58 }
 0xf7f   :  { %2575 = vmatprep.subr.bf16.mxu0 %v2756_v0 }
 0xfd1   :  { %v1387_v61 = vpop.permute.xlu1 %1386 }
 0xfd2   :  { %2540 = vmatmul.mubr.msk.bf16.vlgmr.msra.gmra.mxu1 %vm462_vm3, %v1387_v61 }
 0xfd3   :  { %2552 = vmatpush3.bf16.msra.mxu1 %v2878_v8  ;;  %2555 = vmatprep.mubr.msk.bf16.mxu1 %vm2757_vm0, %v2756_v0 }
 0xfd4   :  { %2553 = vmatprep.subr.bf16.mxu1 %v2756_v0 }
 0xfd7   :  { %2554 = vmatpush3.bf16.msra.mxu1 %v2885_v9 }
 0xfd8   :  { %2567 = vmatprep.subr.bf16.mxu1 %v2756_v0 }
 0xfda   :  { %2556 = vmatmul.mubr.msk.bf16.vlgmr.msra.gmra.mxu1 %vm462_vm3, %v1387_v61  ;;  %v3227_v61 = vld [vmem:[%s3376_s3 + $0x8] sm:$0xff]  }
 0xfdb   :  { %2568 = vmatpush3.bf16.msra.mxu1 %v2920_v50  ;;  %2571 = vmatprep.mubr.msk.bf16.mxu1 %vm2757_vm0, %v2756_v0 }
 0xfdc   :  { %2569 = vmatprep.subr.bf16.mxu1 %v2756_v0 }
 0xfdf   :  { %2570 = vmatpush3.bf16.msra.mxu1 %v2930_v51 }
 0xfe0   :  { %2583 = vmatprep.subr.bf16.mxu1 %v2756_v0 }
0x1039   :  { %v1471_v8 = vpop.f32.mrf.mxu0 }
0x103a   :  { %v1484_v20 = vadd.f32 %v1471_v8, %v2991_v6 }
0x103b   :  { %v2549_v21 = vpop.f32.mrf.mxu0 }
0x103c   :  { %1486 = vrot.lane.b32.xlu1 %v1484_v20, %s2759_s26 }
0x103d   :  { %v1474_v9 = vpop.f32.mrf.mxu0 }
0x103f   :  { %v2550_v22 = vpop.f32.mrf.mxu0 }
0x1092   :  { %v1425_v23 = vpop.f32.mrf.mxu1 }
0x1093   :  { %v1426_v24 = vadd.f32 %v3018_v10, %v1425_v23 }
0x1094   :  { %v2541_v25 = vpop.f32.mrf.mxu1 }
0x1095   :  { %v1477_v26 = vadd.f32 %v1471_v8, %v1426_v24 }
0x1096   :  { %v1428_v27 = vpop.f32.mrf.mxu1 }
0x1097   :  { %v2272_v28 = vmul.f32 -1.442695, %v1477_v26 }
0x1098   :  { %v2542_v29 = vpop.f32.mrf.mxu1 }
0x1099   :  { %2703 = vpow2.f32 %v2272_v28 }
0x109a   :  { %v1550_v30 = vpop.f32.mrf.mxu1 }
0x109b   :  { %v1563_v32 = vadd.f32 %v1550_v30, %v2908_v31  ;;  %v1556_v42 = vadd.f32 %v1550_v30, %v1515_v41 }
0x109c   :  { %v2557_v33 = vpop.f32.mrf.mxu1 }
0x109d   :  { %1565 = vrot.lane.b32.xlu0 %v1563_v32, %s2759_s26  ;;  %v2274_v43 = vmul.f32 -1.442695, %v1556_v42 }
0x109e   :  { %v1553_v34 = vpop.f32.mrf.mxu1 }
0x10a0   :  { %v2558_v35 = vpop.f32.mrf.mxu1 }
0x10a6   :  { %v2704_v36 = vpop.eup %2703 }
0x10a7   :  { %v1481_v37 = vadd.f32 1.0, %v2704_v36 }
0x10a9   :  { %2705 = vrcp.f32 %v1481_v37 }
0x10aa   :  { %2707 = vpow2.f32 %v2274_v43 }
0x10ae   :  { %v1487_v39 = vpop.permute.xlu1 %1486 }
0x10b6   :  { %v2706_v38 = vpop.eup %2705 }
0x10b7   :  { %v1489_v40 = vmul.f32 %v2706_v38, %v1487_v39  ;;  %v2708_v44 = vpop.eup %2707 }
0x10b8   :  { %v1560_v45 = vadd.f32 1.0, %v2708_v44 }
0x10b9   :  { %1491 = vrot.lane.b32.xlu1 %v1489_v40, %s2759_s26 }
0x10ba   :  { %2709 = vrcp.f32 %v1560_v45 }
0x10c7   :  { %v2710_v46 = vpop.eup %2709 }
0x110f   :  { %v1566_v47 = vpop.permute.xlu0 %1565 }
0x1110   :  { %v1568_v48 = vmul.f32 %v2710_v46, %v1566_v47 }
0x1112   :  { %1570 = vrot.lane.b32.xlu0 %v1568_v48, %s2759_s26 }
0x112b   :  { %v1492_v49 = vpop.permute.xlu1 %1491 }
0x112c   :  { %v1494_v52 = vadd.f32 %v1492_v49, %v1426_v24 }
0x112e   :  { %2711 = vtanh.f32 %v1494_v52 }
0x113b   :  { %v2712_v53 = vpop.eup %2711 }
0x113c   :  { %v1496_v54 = vsub.f32 %v3162_v11, %v2712_v53 }
0x113e   :  { %1498 = vrot.lane.b32.xlu1 %v1496_v54, %s2760_s4 }
0x1184   :  { %v1571_v56 = vpop.permute.xlu0 %1570 }
0x1185   :  { %v1573_v57 = vadd.f32 %v1571_v56, %v1515_v41 }
0x1187   :  { %2713 = vtanh.f32 %v1573_v57 }
0x1194   :  { %v2714_v59 = vpop.eup %2713 }
0x1195   :  { %v1575_v60 = vsub.f32 %v3167_v16, %v2714_v59 }
0x1197   :  { %1577 = vrot.lane.b32.xlu0 %v1575_v60, %s2760_s4 }
0x11b0   :  { %v1499_v62 = vpop.permute.xlu1 %1498 }
0x11b1   :  { %v1501_v63 = vmul.f32 %v2706_v38, %v1499_v62  ;;  %v1717_v38 = vld [vmem:[#allocation2 + $0x30] sm:$0xff] }
0x11b3   :  { %1503 = vrot.lane.b32.xlu1 %v1501_v63, %s2761_s28 }
0x1209   :  { %v1578_v1 = vpop.permute.xlu0 %1577 }
0x120a   :  { %v1580_v2 = vmul.f32 %v2710_v46, %v1578_v1 }
0x120c   :  { %1582 = vrot.lane.b32.xlu0 %v1580_v2, %s2761_s28 }
0x1225   :  { %v1504_v3 = vpop.permute.xlu1 %1503 }
0x1226   :  { %v3206_v5 = vadd.f32 %v2712_v53, %v1504_v3 }
0x1228   :  { %v1507_v7 = vpack.c.bf16 %v3206_v5, %v3206_v5 }
0x122a   :  { %1634 = vrot.lane.b32.xlu1 %v1507_v7, %s2759_s26 }
0x127e   :  { %v1583_v13 = vpop.permute.xlu0 %1582 }
0x127f   :  { %v3211_v15 = vadd.f32 %v2714_v59, %v1583_v13 }
0x1281   :  { %v1586_v16 = vpack.c.bf16 %v3211_v15, %v3211_v15 }
0x1283   :  { %1588 = vrot.lane.b32.xlu0 %v1586_v16, %s2759_s26  ;;  %v2751_v16 = vld [vmem:[%s3380_s6 + $0x8] sm:$0xff]  }
0x129c   :  { %v1635_v18 = vpop.permute.xlu1 %1634 }
0x129d   :  { %2572 = vmatmul.mubr.msk.bf16.vlgmr.msra.gmra.mxu1 %vm462_vm3, %v1635_v18  ;;  %v2752_v18 = vld [vmem:[%s3380_s6] sm:$0xff]  }
0x129e   :  { %2584 = vmatpush3.bf16.msra.mxu1 %v2946_v55  ;;  %2587 = vmatprep.mubr.msk.bf16.mxu1 %vm2757_vm0, %v2756_v0  ;;  %v3236_v55 = vld [vmem:[%s3376_s3] sm:$0xff]  }
0x129f   :  { %2585 = vmatprep.subr.bf16.mxu1 %v2756_v0 }
0x12a2   :  { %2586 = vmatpush3.bf16.msra.mxu1 %v2965_v58 }
0x12a3   :  { %2599 = vmatprep.subr.bf16.mxu1 %v2756_v0 }
0x12f5   :  { %v1589_v19 = vpop.permute.xlu0 %1588 }
0x12f6   :  { %2564 = vmatmul.mubr.msk.bf16.vlgmr.msra.gmra.mxu0 %vm462_vm3, %v1589_v19 }
0x12f7   :  { %2576 = vmatpush3.bf16.msra.mxu0 %v3227_v61  ;;  %2579 = vmatprep.mubr.msk.bf16.mxu0 %vm2757_vm0, %v2756_v0 }
0x12f8   :  { %2577 = vmatprep.subr.bf16.mxu0 %v2756_v0 }
0x12fb   :  { %2578 = vmatpush3.bf16.msra.mxu0 %v3236_v55 }
0x12fc   :  { %2591 = vmatprep.subr.bf16.mxu0 %v2756_v0 }
0x12fe   :  { %2580 = vmatmul.mubr.msk.bf16.vlgmr.msra.gmra.mxu0 %vm462_vm3, %v1589_v19 }
0x12ff   :  { %2592 = vmatpush3.bf16.msra.mxu0 %v2920_v50  ;;  %2595 = vmatprep.mubr.msk.bf16.mxu0 %vm2757_vm0, %v2756_v0 }
0x1300   :  { %2593 = vmatprep.subr.bf16.mxu0 %v2756_v0 }
0x1303   :  { %2594 = vmatpush3.bf16.msra.mxu0 %v2930_v51 }
0x1304   :  { %2607 = vmatprep.subr.bf16.mxu0 %v2756_v0 }
0x135d   :  { %v1673_v58 = vpop.f32.mrf.mxu1 }
0x135e   :  { %v1686_v8 = vadd.f32 %v1673_v58, %v2991_v6 }
0x135f   :  { %v2573_v20 = vpop.f32.mrf.mxu1 }
0x1360   :  { %1688 = vrot.lane.b32.xlu1 %v1686_v8, %s2759_s26 }
0x1361   :  { %v1676_v21 = vpop.f32.mrf.mxu1 }
0x1363   :  { %v2574_v9 = vpop.f32.mrf.mxu1 }
0x13b6   :  { %v1627_v22 = vpop.f32.mrf.mxu0 }
0x13b7   :  { %v1628_v50 = vadd.f32 %v3018_v10, %v1627_v22 }
0x13b8   :  { %v2565_v23 = vpop.f32.mrf.mxu0 }
0x13b9   :  { %v1679_v24 = vadd.f32 %v1673_v58, %v1628_v50  ;;  %v2753_v58 = vld [vmem:[%s3379_s7 + $0x8] sm:$0xff]  }
0x13ba   :  { %v1630_v25 = vpop.f32.mrf.mxu0 }
0x13bb   :  { %v2277_v26 = vmul.f32 -1.442695, %v1679_v24 }
0x13bc   :  { %v2566_v27 = vpop.f32.mrf.mxu0 }
0x13bd   :  { %2715 = vpow2.f32 %v2277_v26 }
0x13be   :  { %v1752_v51 = vpop.f32.mrf.mxu0 }
0x13bf   :  { %v1765_v28 = vadd.f32 %v1752_v51, %v2908_v31  ;;  %v1758_v39 = vadd.f32 %v1752_v51, %v1717_v38 }
0x13c0   :  { %v2581_v29 = vpop.f32.mrf.mxu0 }
0x13c1   :  { %1767 = vrot.lane.b32.xlu0 %v1765_v28, %s2759_s26  ;;  %v2279_v40 = vmul.f32 -1.442695, %v1758_v39 }
0x13c2   :  { %v1755_v30 = vpop.f32.mrf.mxu0 }
0x13c4   :  { %v2582_v32 = vpop.f32.mrf.mxu0 }
0x13ca   :  { %v2716_v33 = vpop.eup %2715 }
0x13cb   :  { %v1683_v34 = vadd.f32 1.0, %v2716_v33 }
0x13cd   :  { %2717 = vrcp.f32 %v1683_v34 }
0x13ce   :  { %2719 = vpow2.f32 %v2279_v40 }
0x13d2   :  { %v1689_v36 = vpop.permute.xlu1 %1688 }
0x13da   :  { %v2718_v35 = vpop.eup %2717 }
0x13db   :  { %v1691_v37 = vmul.f32 %v2718_v35, %v1689_v36  ;;  %v2720_v41 = vpop.eup %2719 }
0x13dc   :  { %v1762_v42 = vadd.f32 1.0, %v2720_v41 }
0x13dd   :  { %1693 = vrot.lane.b32.xlu1 %v1691_v37, %s2759_s26  ;;  %v1919_v37 = vld [vmem:[#allocation2 + $0x38] sm:$0xff] }
0x13de   :  { %2721 = vrcp.f32 %v1762_v42 }
0x13eb   :  { %v2722_v43 = vpop.eup %2721 }
0x1433   :  { %v1768_v44 = vpop.permute.xlu0 %1767 }
0x1434   :  { %v1770_v45 = vmul.f32 %v2722_v43, %v1768_v44 }
0x1436   :  { %1772 = vrot.lane.b32.xlu0 %v1770_v45, %s2759_s26 }
0x144f   :  { %v1694_v46 = vpop.permute.xlu1 %1693 }
0x1450   :  { %v1696_v47 = vadd.f32 %v1694_v46, %v1628_v50 }
0x1452   :  { %2723 = vtanh.f32 %v1696_v47 }
0x145f   :  { %v2724_v48 = vpop.eup %2723 }
0x1460   :  { %v1698_v49 = vsub.f32 %v3206_v5, %v2724_v48 }
0x1462   :  { %1700 = vrot.lane.b32.xlu1 %v1698_v49, %s2760_s4 }
0x14a8   :  { %v1773_v52 = vpop.permute.xlu0 %1772 }
0x14a9   :  { %v1775_v53 = vadd.f32 %v1773_v52, %v1717_v38 }
0x14ab   :  { %2725 = vtanh.f32 %v1775_v53 }
0x14b8   :  { %v2726_v54 = vpop.eup %2725 }
0x14b9   :  { %v1777_v56 = vsub.f32 %v3211_v15, %v2726_v54 }
0x14bb   :  { %1779 = vrot.lane.b32.xlu0 %v1777_v56, %s2760_s4 }
0x14d4   :  { %v1701_v57 = vpop.permute.xlu1 %1700 }
0x14d5   :  { %v1703_v59 = vmul.f32 %v2718_v35, %v1701_v57 }
0x14d7   :  { %1705 = vrot.lane.b32.xlu1 %v1703_v59, %s2761_s28 }
0x152d   :  { %v1780_v60 = vpop.permute.xlu0 %1779 }
0x152e   :  { %v1782_v62 = vmul.f32 %v2722_v43, %v1780_v60 }
0x1530   :  { %1784 = vrot.lane.b32.xlu0 %v1782_v62, %s2761_s28 }
0x1549   :  { %v1706_v63 = vpop.permute.xlu1 %1705 }
0x154a   :  { %v3260_v1 = vadd.f32 %v2724_v48, %v1706_v63 }
0x154c   :  { %v1709_v2 = vpack.c.bf16 %v3260_v1, %v3260_v1 }
0x154e   :  { %1836 = vrot.lane.b32.xlu1 %v1709_v2, %s2759_s26 }
0x15a2   :  { %v1785_v3 = vpop.permute.xlu0 %1784 }
0x15a3   :  { %v3265_v7 = vadd.f32 %v2726_v54, %v1785_v3 }
0x15a5   :  { %v1788_v13 = vpack.c.bf16 %v3265_v7, %v3265_v7 }
0x15a7   :  { %1790 = vrot.lane.b32.xlu0 %v1788_v13, %s2759_s26 }
0x15c0   :  { %v1837_v15 = vpop.permute.xlu1 %1836 }
0x15c1   :  { %2596 = vmatmul.mubr.msk.bf16.vlgmr.msra.gmra.mxu0 %vm462_vm3, %v1837_v15 }
0x15c2   :  { %2608 = vmatpush3.bf16.msra.mxu0 %v2751_v16  ;;  %2611 = vmatprep.mubr.msk.bf16.mxu0 %vm2757_vm0, %v2756_v0 }
0x15c3   :  { %2609 = vmatprep.subr.bf16.mxu0 %v2756_v0 }
0x15c6   :  { %2610 = vmatpush3.bf16.msra.mxu0 %v2752_v18 }
0x15c7   :  { %2623 = vmatprep.subr.mxu0 %v2756_v0 }
0x1619   :  { %v1791_v19 = vpop.permute.xlu0 %1790 }
0x161a   :  { %2588 = vmatmul.mubr.msk.bf16.vlgmr.msra.gmra.mxu1 %vm462_vm3, %v1791_v19 }
0x161b   :  { %2600 = vmatpush3.bf16.msra.mxu1 %v3227_v61  ;;  %2603 = vmatprep.mubr.msk.bf16.mxu1 %vm2757_vm0, %v2756_v0  ;;  %v2754_v61 = vld [vmem:[%s3379_s7] sm:$0xff]  }
0x161c   :  { %2601 = vmatprep.subr.bf16.mxu1 %v2756_v0 }
0x161f   :  { %2602 = vmatpush3.bf16.msra.mxu1 %v3236_v55 }
0x1620   :  { %2615 = vmatprep.subr.bf16.mxu1 %v2756_v0 }
0x1622   :  { %2604 = vmatmul.mubr.msk.bf16.vlgmr.msra.gmra.mxu1 %vm462_vm3, %v1791_v19 }
0x1623   :  { %2616 = vmatpush3.bf16.msra.mxu1 %v2753_v58  ;;  %2619 = vmatprep.mubr.msk.bf16.mxu1 %vm2757_vm0, %v2756_v0 }
0x1624   :  { %2617 = vmatprep.subr.bf16.mxu1 %v2756_v0 }
0x1627   :  { %2618 = vmatpush3.bf16.msra.mxu1 %v2754_v61 }
0x1681   :  { %v1875_v55 = vpop.f32.mrf.mxu0 }
0x1682   :  { %v1888_v8 = vadd.f32 %v1875_v55, %v2991_v6 }
0x1683   :  { %v2597_v20 = vpop.f32.mrf.mxu0 }
0x1684   :  { %1890 = vrot.lane.b32.xlu1 %v1888_v8, %s2759_s26  ;;  %v2755_v8 = vld [vmem:[%s3382_s8] ss:$0 sm:$0xff] }
0x1685   :  { %v1878_v21 = vpop.f32.mrf.mxu0 }
0x1687   :  { %v2598_v9 = vpop.f32.mrf.mxu0 }
0x16da   :  { %v1829_v22 = vpop.f32.mrf.mxu1 }
0x16db   :  { %v1830_v50 = vadd.f32 %v3018_v10, %v1829_v22 }
0x16dc   :  { %v2589_v23 = vpop.f32.mrf.mxu1 }
0x16dd   :  { %v1881_v24 = vadd.f32 %v1875_v55, %v1830_v50 }
0x16de   :  { %v1832_v25 = vpop.f32.mrf.mxu1 }
0x16df   :  { %v2282_v26 = vmul.f32 -1.442695, %v1881_v24 }
0x16e0   :  { %v2590_v27 = vpop.f32.mrf.mxu1 }
0x16e1   :  { %2727 = vpow2.f32 %v2282_v26 }
0x16e2   :  { %v1954_v51 = vpop.f32.mrf.mxu1 }
0x16e3   :  { %v1967_v28 = vadd.f32 %v1954_v51, %v2908_v31  ;;  %v1960_v38 = vadd.f32 %v1954_v51, %v1919_v37 }
0x16e4   :  { %v2605_v29 = vpop.f32.mrf.mxu1 }
0x16e5   :  { %1969 = vrot.lane.b32.xlu0 %v1967_v28, %s2759_s26  ;;  %v2284_v39 = vmul.f32 -1.442695, %v1960_v38 }
0x16e6   :  { %v1957_v30 = vpop.f32.mrf.mxu1 }
0x16e8   :  { %v2606_v32 = vpop.f32.mrf.mxu1 }
0x16ee   :  { %v2728_v33 = vpop.eup %2727 }
0x16ef   :  { %v1885_v34 = vadd.f32 1.0, %v2728_v33 }
0x16f1   :  { %2729 = vrcp.f32 %v1885_v34 }
0x16f2   :  { %2731 = vpow2.f32 %v2284_v39 }
0x16f6   :  { %v1891_v36 = vpop.permute.xlu1 %1890 }
0x16fe   :  { %v2730_v35 = vpop.eup %2729 }
0x16ff   :  { %v1893_v10 = vmul.f32 %v2730_v35, %v1891_v36  ;;  %v2732_v40 = vpop.eup %2731 }
0x1700   :  { %v1964_v41 = vadd.f32 1.0, %v2732_v40  ;;  %v2123_v40 = vld [vmem:[%s3384_s10 + $0x18] sm:$0xff] }
0x1701   :  { %1895 = vrot.lane.b32.xlu1 %v1893_v10, %s2759_s26 }
0x1702   :  { %2733 = vrcp.f32 %v1964_v41  ;;  %v2122_v41 = vld [vmem:[%s3384_s10 + $0x10] sm:$0xff] }
0x170f   :  { %v2734_v31 = vpop.eup %2733 }
0x1757   :  { %v1970_v42 = vpop.permute.xlu0 %1969 }
0x1758   :  { %v1972_v43 = vmul.f32 %v2734_v31, %v1970_v42 }
0x175a   :  { %1974 = vrot.lane.b32.xlu0 %v1972_v43, %s2759_s26 }
0x1773   :  { %v1896_v44 = vpop.permute.xlu1 %1895 }
0x1774   :  { %v1898_v45 = vadd.f32 %v1896_v44, %v1830_v50 }
0x1776   :  { %2735 = vtanh.f32 %v1898_v45 }
0x1783   :  { %v2736_v46 = vpop.eup %2735 }
0x1784   :  { %v1900_v47 = vsub.f32 %v3260_v1, %v2736_v46 }
0x1786   :  { %1902 = vrot.lane.b32.xlu1 %v1900_v47, %s2760_s4 }
0x17cc   :  { %v1975_v48 = vpop.permute.xlu0 %1974 }
0x17cd   :  { %v1977_v49 = vadd.f32 %v1975_v48, %v1919_v37 }
0x17cf   :  { %2737 = vtanh.f32 %v1977_v49 }
0x17dc   :  { %v2738_v52 = vpop.eup %2737 }
0x17dd   :  { %v1979_v53 = vsub.f32 %v3265_v7, %v2738_v52 }
0x17df   :  { %1981 = vrot.lane.b32.xlu0 %v1979_v53, %s2760_s4 }
0x17f8   :  { %v1903_v54 = vpop.permute.xlu1 %1902 }
0x17f9   :  { %v1905_v56 = vmul.f32 %v2730_v35, %v1903_v54 }
0x17fb   :  { %1907 = vrot.lane.b32.xlu1 %v1905_v56, %s2761_s28 }
0x1851   :  { %v1982_v57 = vpop.permute.xlu0 %1981 }
0x1852   :  { %v1984_v59 = vmul.f32 %v2734_v31, %v1982_v57  ;;  %v2121_v31 = vld [vmem:[%s3384_s10 + $0x8] sm:$0xff] }
0x1854   :  { %1986 = vrot.lane.b32.xlu0 %v1984_v59, %s2761_s28 }
0x186d   :  { %v1908_v60 = vpop.permute.xlu1 %1907 }
0x186e   :  { %v3311_v62 = vadd.f32 %v2736_v46, %v1908_v60 }
0x1870   :  { %v1911_v63 = vpack.c.bf16 %v3311_v62, %v3311_v62 }
0x1872   :  { %2038 = vrot.lane.b32.xlu1 %v1911_v63, %s2759_s26 }
0x18c6   :  { %v1987_v2 = vpop.permute.xlu0 %1986 }
0x18c7   :  { %v1989_v3 = vadd.f32 %v2738_v52, %v1987_v2 }
0x18c9   :  { %v1990_v7 = vpack.c.bf16 %v1989_v3, %v1989_v3 }
0x18cb   :  { %1992 = vrot.lane.b32.xlu0 %v1990_v7, %s2759_s26 }
0x18e4   :  { %v2039_v13 = vpop.permute.xlu1 %2038 }
0x18e5   :  { %2620 = vmatmul.mubr.msk.bf16.vlgmr.msra.gmra.mxu1 %vm462_vm3, %v2039_v13 }
0x193d   :  { %v1993_v15 = vpop.permute.xlu0 %1992 }
0x193e   :  { %2612 = vmatmul.mubr.msk.bf16.vlgmr.msra.gmra.mxu0 %vm462_vm3, %v1993_v15 }
0x193f   :  { %2631 = vmatprep.mubr.msk.f32.mxu0 %vm2757_vm0, %v2756_v0  ;;  %2624 = vmatpush3.msra.mxu0 %v2123_v40 }
0x1940   :  { %2625 = vmatprep.subr.mxu0 %v2756_v0 }
0x1941   :  { %2626 = vmatpush3.msra.mxu0 %v2122_v41 }
0x1942   :  { %2627 = vmatprep.subr.mxu0 %v2756_v0 }
0x1943   :  { %2628 = vmatpush3.msra.mxu0 %v2121_v31 }
0x1944   :  { %2629 = vmatprep.subr.mxu0 %v2756_v0 }
0x19a5   :  { %v2077_v16 = vpop.f32.mrf.mxu1 }
0x19a6   :  { %v2090_v18 = vadd.f32 %v2077_v16, %v2991_v6  ;;  %v448_v6 = vld [vmem:[%s3383_s1] sm:$0xff] }
0x19a7   :  { %v2621_v19 = vpop.f32.mrf.mxu1  ;;  %vm700_vm4 = vcmp.eq.s32.totalorder %v448_v6, 1  ;;  %vm1306_vm5 = vcmp.eq.s32.totalorder %v448_v6, 4  ;;  %vm1710_vm6 = vcmp.eq.s32.totalorder %v448_v6, 6  ;;  %vm2113_vm7 = vcmp.eq.s32.totalorder %v448_v6, 8 }
0x19a8   :  { %2092 = vrot.lane.b32.xlu1 %v2090_v18, %s2759_s26  ;;  %v701_v28 = vsel %vm700_vm4, 1, %v2758_v4  ;;  %v1307_v29 = vsel %vm1306_vm5, 1, %v2758_v4  ;;  %v1711_v30 = vsel %vm1710_vm6, 1, %v2758_v4  ;;  %v2114_v32 = vsel %vm2113_vm7, 1, %v2758_v4 }
0x19a9   :  { %v2080_v58 = vpop.f32.mrf.mxu1  ;;  %vm902_vm8 = vcmp.eq.s32.totalorder %v448_v6, 2  ;;  %vm1104_vm9 = vcmp.eq.s32.totalorder %v448_v6, 3  ;;  %vm1508_vm10 = vcmp.eq.s32.totalorder %v448_v6, 5  ;;  %vm1912_vm11 = vcmp.eq.s32.totalorder %v448_v6, 7 }
0x19aa   :  { %v903_v10 = vsel %vm902_vm8, 1, %v2758_v4  ;;  %v1105_v37 = vsel %vm1104_vm9, 1, %v2758_v4  ;;  %v1509_v38 = vsel %vm1508_vm10, 1, %v2758_v4  ;;  %v1913_v39 = vsel %vm1912_vm11, 1, %v2758_v4  ;;  %v2120_v4 = vld [vmem:[%s3384_s10] sm:$0xff] }
0x19ab   :  { %v2622_v61 = vpop.f32.mrf.mxu1  ;;  %2630 = vmatpush3.msra.mxu0 %v2120_v4  ;;  %vm2206_vm5 = vcmask 39936  }
0x19fe   :  { %v2031_v55 = vpop.f32.mrf.mxu0 }
0x19ff   :  { %v2032_v20 = vadd.f32 %v2755_v8, %v2031_v55 }
0x1a00   :  { %v2613_v21 = vpop.f32.mrf.mxu0 }
0x1a01   :  { %v2083_v9 = vadd.f32 %v2077_v16, %v2032_v20 }
0x1a02   :  { %v2034_v22 = vpop.f32.mrf.mxu0 }
0x1a03   :  { %v2287_v50 = vmul.f32 -1.442695, %v2083_v9 }
0x1a04   :  { %v2614_v23 = vpop.f32.mrf.mxu0 }
0x1a05   :  { %2739 = vpow2.f32 %v2287_v50 }
0x1a12   :  { %v2740_v24 = vpop.eup %2739 }
0x1a13   :  { %v2087_v25 = vadd.f32 1.0, %v2740_v24 }
0x1a15   :  { %2741 = vrcp.f32 %v2087_v25 }
0x1a1a   :  { %v2093_v27 = vpop.permute.xlu1 %2092 }
0x1a22   :  { %v2742_v26 = vpop.eup %2741 }
0x1a23   :  { %v2095_v51 = vmul.f32 %v2742_v26, %v2093_v27 }
0x1a25   :  { %2097 = vrot.lane.b32.xlu0 %v2095_v51, %s2759_s26 }
0x1a29   :  { %703 = vperm.xlu0 %2640, %v701_v28  }
0x1a2d   :  { %1309 = vperm.xlu0 %2640, %v1307_v29  }
0x1a31   :  { %1713 = vperm.xlu0 %2640, %v1711_v30  }
0x1a35   :  { %2116 = vperm.xlu0 %2640, %v2114_v32  }
0x1a97   :  { %v2098_v33 = vpop.permute.xlu0 %2097 }
0x1a98   :  { %v2100_v34 = vadd.f32 %v2098_v33, %v2032_v20 }
0x1a9a   :  { %2743 = vtanh.f32 %v2100_v34 }
0x1aa4   :  { %v704_v46 = vpop.permute.xlu0 %703 }
0x1aa5   :  { %vm705_vm12 = vcmp.eq.s32.totalorder %v704_v46, 1 }
0x1aa6   :  { %v706_v49 = vsel %vm705_vm12, %v3030_v17, 0.0 }
0x1aa7   :  { %v2744_v35 = vpop.eup %2743 }
0x1aa8   :  { %v2102_v36 = vsub.f32 %v3311_v62, %v2744_v35  ;;  %v1310_v47 = vpop.permute.xlu0 %1309 }
0x1aa9   :  { %vm1311_vm15 = vcmp.eq.s32.totalorder %v1310_v47, 1 }
0x1aaa   :  { %2104 = vrot.lane.b32.xlu1 %v2102_v36, %s2760_s4 }
0x1aac   :  { %v1714_v0 = vpop.permute.xlu0 %1713 }
0x1aad   :  { %vm1715_vm1 = vcmp.eq.s32.totalorder %v1714_v0, 1 }
0x1aae   :  { %905 = vperm.xlu1 %2641, %v903_v10  }
0x1ab0   :  { %v2117_v59 = vpop.permute.xlu0 %2116 }
0x1ab1   :  { %vm2118_vm4 = vcmp.eq.s32.totalorder %v2117_v59, 1 }
0x1ab2   :  { %1107 = vperm.xlu1 %2641, %v1105_v37  }
0x1ab6   :  { %1511 = vperm.xlu1 %2641, %v1509_v38  }
0x1aba   :  { %1915 = vperm.xlu1 %2641, %v1913_v39  }
0x1b1c   :  { %v2105_v42 = vpop.permute.xlu1 %2104 }
0x1b1d   :  { %v2107_v43 = vmul.f32 %v2742_v26, %v2105_v42 }
0x1b1f   :  { %2109 = vrot.lane.b32.xlu1 %v2107_v43, %s2761_s28 }
0x1b29   :  { %v906_v44 = vpop.permute.xlu1 %905 }
0x1b2a   :  { %vm907_vm13 = vcmp.eq.s32.totalorder %v906_v44, 1 }
0x1b2b   :  { %v908_v52 = vsel %vm907_vm13, %v3074_v14, %v706_v49 }
0x1b2d   :  { %v1108_v45 = vpop.permute.xlu1 %1107 }
0x1b2e   :  { %vm1109_vm14 = vcmp.eq.s32.totalorder %v1108_v45, 1 }
0x1b2f   :  { %v1110_v53 = vsel %vm1109_vm14, %v3118_v12, %v908_v52 }
0x1b30   :  { %v1312_v56 = vsel %vm1311_vm15, %v3162_v11, %v1110_v53  ;;  %v2288_v11 = vld [vmem:[%s3385_s11] ss:$0 sm:$0xff] }
0x1b31   :  { %v1512_v48 = vpop.permute.xlu1 %1511 }
0x1b32   :  { %vm1513_vm0 = vcmp.eq.s32.totalorder %v1512_v48, 1 }
0x1b33   :  { %v1514_v57 = vsel %vm1513_vm0, %v3206_v5, %v1312_v56 }
0x1b34   :  { %v1716_v63 = vsel %vm1715_vm1, %v3260_v1, %v1514_v57 }
0x1b35   :  { %v1916_v54 = vpop.permute.xlu1 %1915 }
0x1b36   :  { %vm1917_vm2 = vcmp.eq.s32.totalorder %v1916_v54, 1 }
0x1b37   :  { %v1918_v17 = vsel %vm1917_vm2, %v3311_v62, %v1716_v63 }
0x1b91   :  { %v2110_v60 = vpop.permute.xlu1 %2109 }
0x1b92   :  { %v2112_v2 = vadd.f32 %v2744_v35, %v2110_v60 }
0x1b94   :  { %v2119_v14 = vsel %vm2118_vm4, %v2112_v2, %v1918_v17 }
0x1b95   :  { %2132 = vrot.lane.b32.xlu0 %v2119_v14, %s2759_s26 }
0x1c07   :  { %v2133_v12 = vpop.permute.xlu0 %2132 }
0x1c08   :  { %2632 = vmatmul.mubr.msk.f32.vlgmr.msra.gmra.mxu0 %vm462_vm3, %v2133_v12 }
0x1cc8   :  { %v2202_v5 = vpop.f32.mrf.mxu0 }
0x1cc9   :  { %v2203_v3 = vadd.f32 %v2288_v11, %v2202_v5 }
0x1cca   :  { %v2633_v7 = vpop.f32.mrf.mxu0 }
0x1ccb   :  { %v2207_v1 = vsel %vm2206_vm5, %v2203_v3, -inf }
0x1ccc   :  { %2208 = vmax.xlane.f32.xlu1 %v2207_v1 }
0x1d55   :  { %v2209_v13 = vpop.xlane.xlu1 %2208 }
0x1d56   :  { %v2210_v62 = vsub.f32 %v2203_v3, %v2209_v13 }
0x1d58   :  { %v2211_v15 = vmul.f32 1.442695, %v2210_v62 }
0x1d5a   :  { %2745 = vpow2.f32 %v2211_v15 }
0x1d67   :  { %v2746_v16 = vpop.eup %2745 }
0x1d68   :  { %v2213_v18 = vsel %vm2206_vm5, %v2746_v16, 0.0 }
0x1d69   :  { %2214 = vadd.xlane.f32.xlu0 %v2213_v18 }
0x1df2   :  { %v2215_v19 = vpop.xlane.xlu0 %2214 }
0x1df3   :  { %2747 = vlog2.f32 %v2215_v19 }
0x1e00   :  { %v2748_v58 = vpop.eup %2747 }
0x1e01   :  { %v2217_v61 = vmul.f32 0.6931472, %v2748_v58 }
0x1e03   :  { %v2218_v55 = vsub.f32 %v2210_v62, %v2217_v61 }
0x1e05   :  { %2219 = vst.msk [vmem:[%s3386_s12] sm:$0xff] %vm2206_vm5, %v2218_v55 }

</bundles_post_ra>
